<compile_context>
chip_gen: v6e
topology: v6e:2x2x1
jax: 0.10.0
libtpu: 0.0.40
codegen_flags: <defaults>
</compile_context>

<pallas_src>
import jax
import jax.numpy as jnp
from jax.experimental import pallas as pl
from jax.experimental.pallas import tpu as pltpu

_LANE = 128


def _pad_to_lane(n):
    return ((n + _LANE - 1) // _LANE) * _LANE


def _make_kernel(H, W, Cp, Hp, Op, stride, identity):
    """Build the fused inverted-residual kernel for static (padded) shapes."""
    Ho = (H + 2 - 3) // stride + 1
    Wo = (W + 2 - 3) // stride + 1
    HR = stride * Ho + 2          # halo-scratch height (>= H + 2)
    WC = stride * Wo + 2          # halo-scratch width  (>= W + 2)

    def kernel(x_ref, w1_ref, b1_ref, wdw_ref, b2_ref, w2_ref, b3_ref,
               o_ref, pad_ref):
        x = x_ref[0]                                        # (H, W, Cp) f32

        # ---- 1x1 expand conv (MXU) + bias + ReLU6 ----
        h = jnp.dot(x.reshape(H * W, Cp).astype(jnp.bfloat16), w1_ref[...],
                    preferred_element_type=jnp.float32)
        h = jnp.clip(h + b1_ref[...], 0.0, 6.0).reshape(H, W, Hp)

        # ---- refresh the halo border (done every step, so it stays correct
        #      when the parallel batch axis is split across TensorCores) ----
        pad_ref[pl.ds(0, 1), :, :] = jnp.zeros((1, WC, Hp), jnp.float32)
        pad_ref[pl.ds(H + 1, HR - (H + 1)), :, :] = jnp.zeros(
            (HR - (H + 1), WC, Hp), jnp.float32)
        pad_ref[:, pl.ds(0, 1), :] = jnp.zeros((HR, 1, Hp), jnp.float32)
        pad_ref[:, pl.ds(W + 1, WC - (W + 1)), :] = jnp.zeros(
            (HR, WC - (W + 1), Hp), jnp.float32)
        # interior (in-place, no extra padded value)
        pad_ref[pl.ds(1, H), pl.ds(1, W), :] = h

        # ---- 3x3 depthwise conv (VPU, f32) + bias + ReLU6 ----
        wdw = wdw_ref[...]                                  # (9, Hp), one load
        acc = jnp.zeros((Ho, Wo, Hp), jnp.float32)
        for di in range(3):
            for dj in range(3):
                if stride == 1:
                    win = pad_ref[pl.ds(di, Ho), pl.ds(dj, Wo), :]
                else:
                    # sublane-strided HW load on W; rows subsampled by a
                    # leading-dim reshape (no value-level strided slices).
                    win = pad_ref[pl.ds(di, stride * Ho),
                                  pl.ds(dj, Wo, stride), :]
                    win = win.reshape(Ho, stride, Wo, Hp)[:, 0]
                acc = acc + win * wdw[di * 3 + dj].reshape(1, 1, Hp)
        acc = jnp.clip(acc + b2_ref[...].reshape(1, 1, Hp), 0.0, 6.0)

        # ---- 1x1 projection conv (MXU) + bias (+ residual) ----
        out = jnp.dot(acc.reshape(Ho * Wo, Hp).astype(jnp.bfloat16),
                      w2_ref[...], preferred_element_type=jnp.float32)
        out = (out + b3_ref[...]).reshape(Ho, Wo, Op)
        if identity:                    # static python bool
            out = out + x
        o_ref[0] = out.astype(o_ref.dtype)

    return kernel, Ho, Wo, HR, WC


def inverted_residual_nhwc(x_nhwc, w1, b1, wdw, b2, w2, b3, stride):
    """NHWC entry point (preferred when chaining blocks).
       PyTorch-shaped params:
         w1  : (hidden, inp, 1, 1)   b1 : (hidden,)
         wdw : (hidden, 1, 3, 3)     b2 : (hidden,)
         w2  : (oup, hidden, 1, 1)   b3 : (oup,)"""
    N, H, W, Cin = x_nhwc.shape
    hidden = w1.shape[0]
    oup = w2.shape[0]
    identity = (stride == 1) and (Cin == oup)

    Cp, Hp, Op = _pad_to_lane(Cin), _pad_to_lane(hidden), _pad_to_lane(oup)

    # Lane-dense (128-padded) parameter/activation layout.  Zero padding keeps
    # semantics exact (padded channels stay 0 through every stage).
    x = jnp.pad(x_nhwc.astype(jnp.float32),
                ((0, 0), (0, 0), (0, 0), (0, Cp - Cin)))
    w1_k = jnp.pad(jnp.transpose(w1.reshape(hidden, Cin)),
                   ((0, Cp - Cin), (0, Hp - hidden))).astype(jnp.bfloat16)
    b1_k = jnp.pad(b1, (0, Hp - hidden)).reshape(1, Hp).astype(jnp.float32)
    wdw_k = jnp.pad(jnp.transpose(wdw.reshape(hidden, 9)),
                    ((0, 0), (0, Hp - hidden))).astype(jnp.float32)
    b2_k = jnp.pad(b2, (0, Hp - hidden)).reshape(1, Hp).astype(jnp.float32)
    w2_k = jnp.pad(jnp.transpose(w2.reshape(oup, hidden)),
                   ((0, Hp - hidden), (0, Op - oup))).astype(jnp.bfloat16)
    b3_k = jnp.pad(b3, (0, Op - oup)).reshape(1, Op).astype(jnp.float32)

    kernel, Ho, Wo, HR, WC = _make_kernel(H, W, Cp, Hp, Op, stride, identity)

    out = pl.pallas_call(
        kernel,
        out_shape=jax.ShapeDtypeStruct((N, Ho, Wo, Op), jnp.float32),
        grid=(N,),
        in_specs=[
            pl.BlockSpec((1, H, W, Cp), lambda n: (n, 0, 0, 0)),
            pl.BlockSpec((Cp, Hp), lambda n: (0, 0)),
            pl.BlockSpec((1, Hp), lambda n: (0, 0)),
            pl.BlockSpec((9, Hp), lambda n: (0, 0)),
            pl.BlockSpec((1, Hp), lambda n: (0, 0)),
            pl.BlockSpec((Hp, Op), lambda n: (0, 0)),
            pl.BlockSpec((1, Op), lambda n: (0, 0)),
        ],
        out_specs=pl.BlockSpec((1, Ho, Wo, Op), lambda n: (n, 0, 0, 0)),
        scratch_shapes=[pltpu.VMEM((HR, WC, Hp), jnp.float32)],
        compiler_params=pltpu.CompilerParams(
            dimension_semantics=("parallel",),
            vmem_limit_bytes=32 * 1024 * 1024),
    )(x, w1_k, b1_k, wdw_k, b2_k, w2_k, b3_k)

    return out[..., :oup]                      # drop channel padding


def inverted_residual(x_nchw, w1, b1, wdw, b2, w2, b3, stride):
    """PyTorch-compatible NCHW wrapper (transpose only at network boundary)."""
    x = jnp.transpose(x_nchw, (0, 2, 3, 1))
    out = inverted_residual_nhwc(x, w1, b1, wdw, b2, w2, b3, stride)
    return jnp.transpose(out, (0, 3, 1, 2))


def _reference(x, w1, b1, wdw, b2, w2, b3, stride, identity):
    """Pure-JAX NCHW reference (mirrors the PyTorch forward)."""
    dn = ("NCHW", "OIHW", "NCHW")
    y = jax.lax.conv_general_dilated(x, w1, (1, 1), "VALID",
                                     dimension_numbers=dn)
    y = jnp.clip(y + b1.reshape(1, -1, 1, 1), 0.0, 6.0)
    y = jax.lax.conv_general_dilated(y, wdw, (stride, stride),
                                     ((1, 1), (1, 1)),
                                     dimension_numbers=dn,
                                     feature_group_count=wdw.shape[0])
    y = jnp.clip(y + b2.reshape(1, -1, 1, 1), 0.0, 6.0)
    y = jax.lax.conv_general_dilated(y, w2, (1, 1), "VALID",
                                     dimension_numbers=dn)
    y = y + b3.reshape(1, -1, 1, 1)
    return x + y if identity else y


if __name__ == "__main__":
    key = jax.random.PRNGKey(0)

    def make_case(case_key, n, inp, oup, h, w, expand_ratio):
        hidden = round(inp * expand_ratio)
        k = jax.random.split(case_key, 7)
        x = jax.random.normal(k[0], (n, inp, h, w), jnp.float32)
        w1 = 0.1 * jax.random.normal(k[1], (hidden, inp, 1, 1), jnp.float32)
        b1 = 0.1 * jax.random.normal(k[2], (hidden,), jnp.float32)
        wdw = 0.1 * jax.random.normal(k[3], (hidden, 1, 3, 3), jnp.float32)
        b2 = 0.1 * jax.random.normal(k[4], (hidden,), jnp.float32)
        w2 = 0.1 * jax.random.normal(k[5], (oup, hidden, 1, 1), jnp.float32)
        b3 = 0.1 * jax.random.normal(k[6], (oup,), jnp.float32)
        return x, w1, b1, wdw, b2, w2, b3

    # (inp, oup, H, W, expand_ratio, stride):
    #   case 1: stride=1 exercises the identity-residual path
    #   case 2: stride=2 with odd H validates the strided depthwise path
    cases = [(8, 8, 16, 16, 2, 1),
             (8, 16, 15, 16, 3, 2)]
    case_keys = jax.random.split(key, len(cases))

    for ck, (inp, oup, H, W, er, stride) in zip(case_keys, cases):
        x, w1, b1, wdw, b2, w2, b3 = make_case(ck, 2, inp, oup, H, W, er)
        out = inverted_residual(x, w1, b1, wdw, b2, w2, b3, stride)
        out = jax.block_until_ready(out)

        identity = (stride == 1) and (inp == oup)
        ref = _reference(x, w1, b1, wdw, b2, w2, b3, stride, identity)
        assert out.shape == ref.shape, (out.shape, ref.shape)
        max_err = float(jnp.max(jnp.abs(out - ref)))
        # bf16 MXU inputs (with f32 accumulation) -> small quantization error
        # vs. the pure-f32 reference.
        assert jnp.allclose(out, ref, atol=3e-2, rtol=3e-2), max_err

    print("KERNEL_OK")
</pallas_src>

<mosaic_0001>
module attributes {stable_mosaic.version = 11 : i64} {
  func.func @kernel(%arg0: i32, %arg1: memref<1x16x16x128xf32, #tpu.memory_space<vmem>>, %arg2: memref<128x128xbf16, #tpu.memory_space<vmem>>, %arg3: memref<1x128xf32, #tpu.memory_space<vmem>>, %arg4: memref<9x128xf32, #tpu.memory_space<vmem>>, %arg5: memref<1x128xf32, #tpu.memory_space<vmem>>, %arg6: memref<128x128xbf16, #tpu.memory_space<vmem>>, %arg7: memref<1x128xf32, #tpu.memory_space<vmem>>, %arg8: memref<1x16x16x128xf32, #tpu.memory_space<vmem>>, %arg9: memref<18x18x128xf32, #tpu.memory_space<vmem>>) attributes {dimension_semantics = [#tpu.dimension_semantics<parallel>], iteration_bounds = array<i64: 2>, scalar_prefetch = 0 : i64, scratch_operands = 1 : i64, tpu.core_type = #tpu.core_type<tc>, window_params = [{transform_indices = @transform_0, window_bounds = array<i64: 1, 16, 16, 128>}, {pipeline_mode = #tpu.pipeline_mode<synchronous>, transform_indices = @transform_1, window_bounds = array<i64: 128, 128>}, {pipeline_mode = #tpu.pipeline_mode<synchronous>, transform_indices = @transform_2, window_bounds = array<i64: 1, 128>}, {pipeline_mode = #tpu.pipeline_mode<synchronous>, transform_indices = @transform_3, window_bounds = array<i64: 9, 128>}, {pipeline_mode = #tpu.pipeline_mode<synchronous>, transform_indices = @transform_4, window_bounds = array<i64: 1, 128>}, {pipeline_mode = #tpu.pipeline_mode<synchronous>, transform_indices = @transform_5, window_bounds = array<i64: 128, 128>}, {pipeline_mode = #tpu.pipeline_mode<synchronous>, transform_indices = @transform_6, window_bounds = array<i64: 1, 128>}, {transform_indices = @transform_7, window_bounds = array<i64: 1, 16, 16, 128>}]} {
    %c0 = arith.constant 0 : index
    %c0_0 = arith.constant 0 : index
    %c0_1 = arith.constant 0 : index
    %c0_2 = arith.constant 0 : index
    %0 = vector.load %arg1[%c0, %c0_0, %c0_1, %c0_2] : memref<1x16x16x128xf32, #tpu.memory_space<vmem>>, vector<1x16x16x128xf32>
    %1 = vector.shape_cast %0 : vector<1x16x16x128xf32> to vector<16x16x128xf32>
    %2 = vector.shape_cast %1 : vector<16x16x128xf32> to vector<256x128xf32>
    %3 = arith.truncf %2 : vector<256x128xf32> to vector<256x128xbf16>
    %c0_3 = arith.constant 0 : index
    %c0_4 = arith.constant 0 : index
    %4 = vector.load %arg2[%c0_3, %c0_4] : memref<128x128xbf16, #tpu.memory_space<vmem>>, vector<128x128xbf16>
    %cst = arith.constant dense<0.000000e+00> : vector<256x128xf32>
    %5 = tpu.matmul %3, %4, %cst {dimension_numbers = #tpu.dot_dimension_numbers<[1], [0], [0], [1], [0, 0, 1, 1], [], []>} : vector<256x128xbf16>, vector<128x128xbf16>, vector<256x128xf32> -> vector<256x128xf32>
    %c0_5 = arith.constant 0 : index
    %c0_6 = arith.constant 0 : index
    %6 = vector.load %arg3[%c0_5, %c0_6] : memref<1x128xf32, #tpu.memory_space<vmem>>, vector<1x128xf32>
    %7 = vector.broadcast %6 : vector<1x128xf32> to vector<256x128xf32>
    %8 = arith.addf %5, %7 : vector<256x128xf32>
    %cst_7 = arith.constant 0.000000e+00 : f32
    %cst_8 = arith.constant 6.000000e+00 : f32
    %9 = vector.broadcast %cst_7 : f32 to vector<256x128xf32>
    %10 = arith.maximumf %9, %8 : vector<256x128xf32>
    %11 = vector.broadcast %cst_8 : f32 to vector<256x128xf32>
    %12 = arith.minimumf %11, %10 : vector<256x128xf32>
    %13 = vector.shape_cast %12 : vector<256x128xf32> to vector<16x16x128xf32>
    %cst_9 = arith.constant 0.000000e+00 : f32
    %14 = vector.broadcast %cst_9 : f32 to vector<1x18x128xf32>
    %c0_10 = arith.constant 0 : index
    %c0_11 = arith.constant 0 : index
    %c0_12 = arith.constant 0 : index
    %15 = vector.load %arg9[%c0_10, %c0_11, %c0_12] : memref<18x18x128xf32, #tpu.memory_space<vmem>>, vector<1x18x128xf32>
    tpu.vector_store %arg9[%c0_10, %c0_11, %c0_12], %14 {strides = array<i32>} : memref<18x18x128xf32, #tpu.memory_space<vmem>>, vector<1x18x128xf32>,
    %cst_13 = arith.constant 0.000000e+00 : f32
    %16 = vector.broadcast %cst_13 : f32 to vector<1x18x128xf32>
    %c17 = arith.constant 17 : index
    %c0_14 = arith.constant 0 : index
    %c0_15 = arith.constant 0 : index
    %17 = vector.load %arg9[%c17, %c0_14, %c0_15] : memref<18x18x128xf32, #tpu.memory_space<vmem>>, vector<1x18x128xf32>
    tpu.vector_store %arg9[%c17, %c0_14, %c0_15], %16 {strides = array<i32>} : memref<18x18x128xf32, #tpu.memory_space<vmem>>, vector<1x18x128xf32>,
    %cst_16 = arith.constant 0.000000e+00 : f32
    %18 = vector.broadcast %cst_16 : f32 to vector<18x1x128xf32>
    %c0_17 = arith.constant 0 : index
    %c0_18 = arith.constant 0 : index
    %c0_19 = arith.constant 0 : index
    %19 = vector.load %arg9[%c0_17, %c0_18, %c0_19] : memref<18x18x128xf32, #tpu.memory_space<vmem>>, vector<18x1x128xf32>
    tpu.vector_store %arg9[%c0_17, %c0_18, %c0_19], %18 {strides = array<i32>} : memref<18x18x128xf32, #tpu.memory_space<vmem>>, vector<18x1x128xf32>,
    %cst_20 = arith.constant 0.000000e+00 : f32
    %20 = vector.broadcast %cst_20 : f32 to vector<18x1x128xf32>
    %c0_21 = arith.constant 0 : index
    %c17_22 = arith.constant 17 : index
    %c0_23 = arith.constant 0 : index
    %21 = vector.load %arg9[%c0_21, %c17_22, %c0_23] : memref<18x18x128xf32, #tpu.memory_space<vmem>>, vector<18x1x128xf32>
    tpu.vector_store %arg9[%c0_21, %c17_22, %c0_23], %20 {strides = array<i32>} : memref<18x18x128xf32, #tpu.memory_space<vmem>>, vector<18x1x128xf32>,
    %c1 = arith.constant 1 : index
    %c1_24 = arith.constant 1 : index
    %c0_25 = arith.constant 0 : index
    %22 = vector.load %arg9[%c1, %c1_24, %c0_25] : memref<18x18x128xf32, #tpu.memory_space<vmem>>, vector<16x16x128xf32>
    tpu.vector_store %arg9[%c1, %c1_24, %c0_25], %13 {strides = array<i32>} : memref<18x18x128xf32, #tpu.memory_space<vmem>>, vector<16x16x128xf32>,
    %c0_26 = arith.constant 0 : index
    %c0_27 = arith.constant 0 : index
    %23 = vector.load %arg4[%c0_26, %c0_27] : memref<9x128xf32, #tpu.memory_space<vmem>>, vector<9x128xf32>
    %cst_28 = arith.constant 0.000000e+00 : f32
    %24 = vector.broadcast %cst_28 : f32 to vector<16x16x128xf32>
    %c0_29 = arith.constant 0 : index
    %c0_30 = arith.constant 0 : index
    %c0_31 = arith.constant 0 : index
    %25 = vector.load %arg9[%c0_29, %c0_30, %c0_31] : memref<18x18x128xf32, #tpu.memory_space<vmem>>, vector<16x16x128xf32>
    %26 = vector.extract_strided_slice %23 {offsets = [0, 0], sizes = [1, 128], strides = [1, 1]} : vector<9x128xf32> to vector<1x128xf32>
    %27 = vector.shape_cast %26 : vector<1x128xf32> to vector<128xf32>
    %28 = vector.shape_cast %27 : vector<128xf32> to vector<1x1x128xf32>
    %29 = vector.broadcast %28 : vector<1x1x128xf32> to vector<16x16x128xf32>
    %30 = arith.mulf %25, %29 : vector<16x16x128xf32>
    %31 = arith.addf %24, %30 : vector<16x16x128xf32>
    %c0_32 = arith.constant 0 : index
    %c1_33 = arith.constant 1 : index
    %c0_34 = arith.constant 0 : index
    %32 = vector.load %arg9[%c0_32, %c1_33, %c0_34] : memref<18x18x128xf32, #tpu.memory_space<vmem>>, vector<16x16x128xf32>
    %33 = vector.extract_strided_slice %23 {offsets = [1, 0], sizes = [1, 128], strides = [1, 1]} : vector<9x128xf32> to vector<1x128xf32>
    %34 = vector.shape_cast %33 : vector<1x128xf32> to vector<128xf32>
    %35 = vector.shape_cast %34 : vector<128xf32> to vector<1x1x128xf32>
    %36 = vector.broadcast %35 : vector<1x1x128xf32> to vector<16x16x128xf32>
    %37 = arith.mulf %32, %36 : vector<16x16x128xf32>
    %38 = arith.addf %31, %37 : vector<16x16x128xf32>
    %c0_35 = arith.constant 0 : index
    %c2 = arith.constant 2 : index
    %c0_36 = arith.constant 0 : index
    %39 = vector.load %arg9[%c0_35, %c2, %c0_36] : memref<18x18x128xf32, #tpu.memory_space<vmem>>, vector<16x16x128xf32>
    %40 = vector.extract_strided_slice %23 {offsets = [2, 0], sizes = [1, 128], strides = [1, 1]} : vector<9x128xf32> to vector<1x128xf32>
    %41 = vector.shape_cast %40 : vector<1x128xf32> to vector<128xf32>
    %42 = vector.shape_cast %41 : vector<128xf32> to vector<1x1x128xf32>
    %43 = vector.broadcast %42 : vector<1x1x128xf32> to vector<16x16x128xf32>
    %44 = arith.mulf %39, %43 : vector<16x16x128xf32>
    %45 = arith.addf %38, %44 : vector<16x16x128xf32>
    %c1_37 = arith.constant 1 : index
    %c0_38 = arith.constant 0 : index
    %c0_39 = arith.constant 0 : index
    %46 = vector.load %arg9[%c1_37, %c0_38, %c0_39] : memref<18x18x128xf32, #tpu.memory_space<vmem>>, vector<16x16x128xf32>
    %47 = vector.extract_strided_slice %23 {offsets = [3, 0], sizes = [1, 128], strides = [1, 1]} : vector<9x128xf32> to vector<1x128xf32>
    %48 = vector.shape_cast %47 : vector<1x128xf32> to vector<128xf32>
    %49 = vector.shape_cast %48 : vector<128xf32> to vector<1x1x128xf32>
    %50 = vector.broadcast %49 : vector<1x1x128xf32> to vector<16x16x128xf32>
    %51 = arith.mulf %46, %50 : vector<16x16x128xf32>
    %52 = arith.addf %45, %51 : vector<16x16x128xf32>
    %c1_40 = arith.constant 1 : index
    %c1_41 = arith.constant 1 : index
    %c0_42 = arith.constant 0 : index
    %53 = vector.load %arg9[%c1_40, %c1_41, %c0_42] : memref<18x18x128xf32, #tpu.memory_space<vmem>>, vector<16x16x128xf32>
    %54 = vector.extract_strided_slice %23 {offsets = [4, 0], sizes = [1, 128], strides = [1, 1]} : vector<9x128xf32> to vector<1x128xf32>
    %55 = vector.shape_cast %54 : vector<1x128xf32> to vector<128xf32>
    %56 = vector.shape_cast %55 : vector<128xf32> to vector<1x1x128xf32>
    %57 = vector.broadcast %56 : vector<1x1x128xf32> to vector<16x16x128xf32>
    %58 = arith.mulf %53, %57 : vector<16x16x128xf32>
    %59 = arith.addf %52, %58 : vector<16x16x128xf32>
    %c1_43 = arith.constant 1 : index
    %c2_44 = arith.constant 2 : index
    %c0_45 = arith.constant 0 : index
    %60 = vector.load %arg9[%c1_43, %c2_44, %c0_45] : memref<18x18x128xf32, #tpu.memory_space<vmem>>, vector<16x16x128xf32>
    %61 = vector.extract_strided_slice %23 {offsets = [5, 0], sizes = [1, 128], strides = [1, 1]} : vector<9x128xf32> to vector<1x128xf32>
    %62 = vector.shape_cast %61 : vector<1x128xf32> to vector<128xf32>
    %63 = vector.shape_cast %62 : vector<128xf32> to vector<1x1x128xf32>
    %64 = vector.broadcast %63 : vector<1x1x128xf32> to vector<16x16x128xf32>
    %65 = arith.mulf %60, %64 : vector<16x16x128xf32>
    %66 = arith.addf %59, %65 : vector<16x16x128xf32>
    %c2_46 = arith.constant 2 : index
    %c0_47 = arith.constant 0 : index
    %c0_48 = arith.constant 0 : index
    %67 = vector.load %arg9[%c2_46, %c0_47, %c0_48] : memref<18x18x128xf32, #tpu.memory_space<vmem>>, vector<16x16x128xf32>
    %68 = vector.extract_strided_slice %23 {offsets = [6, 0], sizes = [1, 128], strides = [1, 1]} : vector<9x128xf32> to vector<1x128xf32>
    %69 = vector.shape_cast %68 : vector<1x128xf32> to vector<128xf32>
    %70 = vector.shape_cast %69 : vector<128xf32> to vector<1x1x128xf32>
    %71 = vector.broadcast %70 : vector<1x1x128xf32> to vector<16x16x128xf32>
    %72 = arith.mulf %67, %71 : vector<16x16x128xf32>
    %73 = arith.addf %66, %72 : vector<16x16x128xf32>
    %c2_49 = arith.constant 2 : index
    %c1_50 = arith.constant 1 : index
    %c0_51 = arith.constant 0 : index
    %74 = vector.load %arg9[%c2_49, %c1_50, %c0_51] : memref<18x18x128xf32, #tpu.memory_space<vmem>>, vector<16x16x128xf32>
    %75 = vector.extract_strided_slice %23 {offsets = [7, 0], sizes = [1, 128], strides = [1, 1]} : vector<9x128xf32> to vector<1x128xf32>
    %76 = vector.shape_cast %75 : vector<1x128xf32> to vector<128xf32>
    %77 = vector.shape_cast %76 : vector<128xf32> to vector<1x1x128xf32>
    %78 = vector.broadcast %77 : vector<1x1x128xf32> to vector<16x16x128xf32>
    %79 = arith.mulf %74, %78 : vector<16x16x128xf32>
    %80 = arith.addf %73, %79 : vector<16x16x128xf32>
    %c2_52 = arith.constant 2 : index
    %c2_53 = arith.constant 2 : index
    %c0_54 = arith.constant 0 : index
    %81 = vector.load %arg9[%c2_52, %c2_53, %c0_54] : memref<18x18x128xf32, #tpu.memory_space<vmem>>, vector<16x16x128xf32>
    %82 = vector.extract_strided_slice %23 {offsets = [8, 0], sizes = [1, 128], strides = [1, 1]} : vector<9x128xf32> to vector<1x128xf32>
    %83 = vector.shape_cast %82 : vector<1x128xf32> to vector<128xf32>
    %84 = vector.shape_cast %83 : vector<128xf32> to vector<1x1x128xf32>
    %85 = vector.broadcast %84 : vector<1x1x128xf32> to vector<16x16x128xf32>
    %86 = arith.mulf %81, %85 : vector<16x16x128xf32>
    %87 = arith.addf %80, %86 : vector<16x16x128xf32>
    %c0_55 = arith.constant 0 : index
    %c0_56 = arith.constant 0 : index
    %88 = vector.load %arg5[%c0_55, %c0_56] : memref<1x128xf32, #tpu.memory_space<vmem>>, vector<1x128xf32>
    %89 = vector.shape_cast %88 : vector<1x128xf32> to vector<1x1x128xf32>
    %90 = vector.broadcast %89 : vector<1x1x128xf32> to vector<16x16x128xf32>
    %91 = arith.addf %87, %90 : vector<16x16x128xf32>
    %cst_57 = arith.constant 0.000000e+00 : f32
    %cst_58 = arith.constant 6.000000e+00 : f32
    %92 = vector.broadcast %cst_57 : f32 to vector<16x16x128xf32>
    %93 = arith.maximumf %92, %91 : vector<16x16x128xf32>
    %94 = vector.broadcast %cst_58 : f32 to vector<16x16x128xf32>
    %95 = arith.minimumf %94, %93 : vector<16x16x128xf32>
    %96 = vector.shape_cast %95 : vector<16x16x128xf32> to vector<256x128xf32>
    %97 = arith.truncf %96 : vector<256x128xf32> to vector<256x128xbf16>
    %c0_59 = arith.constant 0 : index
    %c0_60 = arith.constant 0 : index
    %98 = vector.load %arg6[%c0_59, %c0_60] : memref<128x128xbf16, #tpu.memory_space<vmem>>, vector<128x128xbf16>
    %cst_61 = arith.constant dense<0.000000e+00> : vector<256x128xf32>
    %99 = tpu.matmul %97, %98, %cst_61 {dimension_numbers = #tpu.dot_dimension_numbers<[1], [0], [0], [1], [0, 0, 1, 1], [], []>} : vector<256x128xbf16>, vector<128x128xbf16>, vector<256x128xf32> -> vector<256x128xf32>
    %c0_62 = arith.constant 0 : index
    %c0_63 = arith.constant 0 : index
    %100 = vector.load %arg7[%c0_62, %c0_63] : memref<1x128xf32, #tpu.memory_space<vmem>>, vector<1x128xf32>
    %101 = vector.broadcast %100 : vector<1x128xf32> to vector<256x128xf32>
    %102 = arith.addf %99, %101 : vector<256x128xf32>
    %103 = vector.shape_cast %102 : vector<256x128xf32> to vector<16x16x128xf32>
    %104 = arith.addf %103, %1 : vector<16x16x128xf32>
    %c0_64 = arith.constant 0 : index
    %c0_65 = arith.constant 0 : index
    %c0_66 = arith.constant 0 : index
    %c0_67 = arith.constant 0 : index
    %105 = vector.load %arg8[%c0_64, %c0_65, %c0_66, %c0_67] : memref<1x16x16x128xf32, #tpu.memory_space<vmem>>, vector<1x16x16x128xf32>
    %106 = vector.shape_cast %105 : vector<1x16x16x128xf32> to vector<16x16x128xf32>
    %107 = vector.shape_cast %104 : vector<16x16x128xf32> to vector<1x16x16x128xf32>
    tpu.vector_store %arg8[%c0_64, %c0_65, %c0_66, %c0_67], %107 {strides = array<i32>} : memref<1x16x16x128xf32, #tpu.memory_space<vmem>>, vector<1x16x16x128xf32>,
    return
  }
  func.func @transform_0(%arg0: i32) -> (i32, i32, i32, i32) {
    %c0_i32 = arith.constant 0 : i32
    %c0_i32_0 = arith.constant 0 : i32
    %c0_i32_1 = arith.constant 0 : i32
    %c0_i32_2 = arith.constant 0 : i32
    return %arg0, %c0_i32, %c0_i32_0, %c0_i32_1 : i32, i32, i32, i32
  }
  func.func @transform_1(%arg0: i32) -> (i32, i32) {
    %c0_i32 = arith.constant 0 : i32
    %c0_i32_0 = arith.constant 0 : i32
    %c0_i32_1 = arith.constant 0 : i32
    return %c0_i32, %c0_i32_0 : i32, i32
  }
  func.func @transform_2(%arg0: i32) -> (i32, i32) {
    %c0_i32 = arith.constant 0 : i32
    %c0_i32_0 = arith.constant 0 : i32
    %c0_i32_1 = arith.constant 0 : i32
    return %c0_i32, %c0_i32_0 : i32, i32
  }
  func.func @transform_3(%arg0: i32) -> (i32, i32) {
    %c0_i32 = arith.constant 0 : i32
    %c0_i32_0 = arith.constant 0 : i32
    %c0_i32_1 = arith.constant 0 : i32
    return %c0_i32, %c0_i32_0 : i32, i32
  }
  func.func @transform_4(%arg0: i32) -> (i32, i32) {
    %c0_i32 = arith.constant 0 : i32
    %c0_i32_0 = arith.constant 0 : i32
    %c0_i32_1 = arith.constant 0 : i32
    return %c0_i32, %c0_i32_0 : i32, i32
  }
  func.func @transform_5(%arg0: i32) -> (i32, i32) {
    %c0_i32 = arith.constant 0 : i32
    %c0_i32_0 = arith.constant 0 : i32
    %c0_i32_1 = arith.constant 0 : i32
    return %c0_i32, %c0_i32_0 : i32, i32
  }
  func.func @transform_6(%arg0: i32) -> (i32, i32) {
    %c0_i32 = arith.constant 0 : i32
    %c0_i32_0 = arith.constant 0 : i32
    %c0_i32_1 = arith.constant 0 : i32
    return %c0_i32, %c0_i32_0 : i32, i32
  }
  func.func @transform_7(%arg0: i32) -> (i32, i32, i32, i32) {
    %c0_i32 = arith.constant 0 : i32
    %c0_i32_0 = arith.constant 0 : i32
    %c0_i32_1 = arith.constant 0 : i32
    %c0_i32_2 = arith.constant 0 : i32
    return %arg0, %c0_i32, %c0_i32_0, %c0_i32_1 : i32, i32, i32, i32
  }
}

</mosaic_0001>

<bundles_post_ra>
// kernel: tpu_custom_call.1
= control target key start
LH: loop header
LB: loop body
LE: loop exit
PB: predicated region body
PF: predicated region fallthrough
CT: control target
= control target key end

     0   :  { %s3904_s0 = inlined_call_operand.hbm [shape: f32[2,16,16,128], index: 0, kind: input, shape index: {}]   ;;  %s3905_s1 = inlined_call_operand.hbm [shape: bf16[128,128], index: 1, kind: input, shape index: {}]   ;;  %s3906_s2 = inlined_call_operand.vmem [shape: f32[1,128], index: 2, kind: input, shape index: {}]   ;;  %s3907_s3 = inlined_call_operand.hbm [shape: f32[9,128], index: 3, kind: input, shape index: {}]   ;;  %s3908_s4 = inlined_call_operand.vmem [shape: f32[1,128], index: 4, kind: input, shape index: {}]   ;;  %s3909_s5 = inlined_call_operand.hbm [shape: bf16[128,128], index: 5, kind: input, shape index: {}]   ;;  %s3910_s6 = inlined_call_operand.vmem [shape: f32[1,128], index: 6, kind: input, shape index: {}]   ;;  %s3911_s7 = inlined_call_operand.hbm [shape: f32[2,16,16,128], index: 7, kind: output, shape index: {}]  }
   0x1   :  { %3918 = sst [smem:[#allocation16_spill]] %s3905_s1 }
   0x2   :  { %12 = vsyncpa [#allocation4], 0 }
   0x3   :  { %14 = vsyncpa [#allocation4 + $0x1], 0 }
   0x4   :  { %15 = vsyncpa [#allocation7], 0 }
   0x5   :  { %16 = vsyncpa [#allocation10], 0 }
   0x6   :  { %17 = vsyncpa [#allocation5], 0 }
   0x7   :  { %19 = vsyncpa [#allocation5 + $0x1], 0  ;;  %s2749_s24 = smov 0   ;;  %s2751_s25 = smov 0  }
   0x8   :  { %s2753_s26 = smov 0   ;;  %s2755_s27 = smov 0  }
   0x9 LB: > { %s2770_s28 = sadd.s32 4294967295, %s2695_s27   ;;  %s2196_s29 = sadd.s32 4294967294, %s2695_s27   ;;  %s2695_s27 = sphi %s2755_s27, %s3940_s27   ;;  %s2691_s26 = sphi %s2753_s26, %s3939_s26   ;;  %s2687_s25 = sphi %s2751_s25, %s3938_s25   ;;  %s2683_s24 = sphi %s2749_s24, %s3937_s24  }
   0xa   : > { %p45_p0 = scmp.ne.s32.totalorder %s2687_s25, %s2683_s24  ;;  %p3913_p1 = scmp.eq.s32.totalorder %s2770_s28, 0 }
   0xb   : > { %p195_p2 = scmp.eq.s32.totalorder %s2770_s28, 1  ;;  %p201_p3 = scmp.eq.s32.totalorder %s2196_s29, 1 }
   0xc   : > { %p2779_p4 = por %p3913_p1, %p45_p0  ;;  %p2197_p5 = scmp.ge.s32.totalorder %s2695_s27, 1 }
   0xd   : > { %p2784_p6 = por %p201_p3, %p45_p0  ;;  %p208_p7 = scmp.lt.s32.totalorder %s2695_s27, 3 }
   0xe   : > { %s3919_s30 = scalar_select %p2779_p4, 1, 0 }
   0xf   : > { %s3920_s8 = scalar_select %p2784_p6, 1, 0 }
  0x10   : > { %p2789_p8 = pnand %p2197_p5, %p208_p7  ;;  %s2697_s10 = smov [#allocation6]  }
  0x11   : > { %s220_s11 = sshll.u32 %s2697_s10, 4  ;;  %s2698_s13 = smov [#allocation8]   ;;  %s221_s11 = int_to_ptr.vmem [resolvable:$true] %s220_s11 }
  0x12   : > { %s3921_s9 = scalar_select %p2789_p8, 1, 0 }
  0x13   : > { %p2398_p9 = pneg %p2789_p8  ;;  %s236_s14 = sshll.u32 %s2698_s13, 4  ;;  %s237_s14 = int_to_ptr.vmem [resolvable:$true] %s236_s14 }
  0x14   : > { %s2528_s15 = scalar_lea.vmem %s221_s11, 1024  ;;  %p2536_p5 = scmp.lt.s32.totalorder %s221_s11, %s221_s11 }
  0x15   : > { %p2798_p11 = pnand %p2398_p9, %p3913_p1  ;;  %p2529_p13 = scmp.ne.s32.totalorder %s221_s11, %s2528_s15 }
  0x16   : > { %p2537_p7 = scmp.lt.s32.totalorder %s2528_s15, %s2528_s15 }
  0x17   : > { %p2519_p12 = pneg %p2798_p11 }
  0x18   : > { %p2538_p10 = por %p2537_p7, %p2536_p5 }
  0x19   : > { %p2531_p0 = pnand %p2529_p13, %p2519_p12 }
  0x1b   : > { %p2532_p3 = pneg %p2531_p0 }
  0x1d   : > { %p2539_p9 = pnand %p2538_p10, %p2532_p3 }
  0x1f   : > { %2542 = shalt.err (!%p2539_p9)
}
  0x20   : > { %s2699_s16 = smov 64   ;;  %s2700_s17 = smov 4  }
  0x21   : > { %s3923_s1 = sld [smem:[#allocation16_spill]]  ;;  %s2554_s20 = scalar_lea.vmem %s237_s14, 256 }
  0x22   : > { %p2555_p13 = scmp.ne.s32.totalorder %s237_s14, %s2554_s20  ;;  %p2562_p10 = scmp.lt.s32.totalorder %s237_s14, %s237_s14 }
  0x23   : > { %p2563_p3 = scmp.lt.s32.totalorder %s2554_s20, %s2554_s20 }
  0x24   : > { %p2557_p0 = pnand %p2555_p13, %p2519_p12 }
  0x25   : > { %p2564_p7 = por %p2563_p3, %p2562_p10 }
  0x26   : > { %p2558_p5 = pneg %p2557_p0 }
  0x27   : > { %2401 = dma.hbm_to_vmem [thread:$0]  (!%p2798_p11), %s3923_s1, 1024, %s221_s11, [#allocation7], %s2699_s16, %s2699_s16, %s2700_s17  }
  0x28   : > { %p2565_p9 = pnand %p2564_p7, %p2558_p5 }
  0x2a   : > { %2568 = shalt.err (!%p2565_p9)
}
  0x2b   : > { %s3912_s21 = smov 128   ;;  %s3914_s22 = smov 8  }
  0x2c   : > { %2404 = dma.hbm_to_vmem [thread:$0]  (!%p2798_p11), %s3907_s3, 256, %s237_s14, [#allocation7], %s3912_s21, %s3912_s21, %s3914_s22  }
  0x2d   : > { %s2703_s10 = smov [#allocation9]   ;;  %s2827_s13 = sadd.s32 1, %s2695_s27  }
  0x2e   : > { %s252_s11 = sshll.u32 %s2703_s10, 4  ;;  %s253_s11 = int_to_ptr.vmem [resolvable:$true] %s252_s11 }
  0x2f   : > { %s2580_s15 = scalar_lea.vmem %s253_s11, 1024  ;;  %p2588_p10 = scmp.lt.s32.totalorder %s253_s11, %s253_s11 }
  0x30   : > { %p2581_p13 = scmp.ne.s32.totalorder %s253_s11, %s2580_s15  ;;  %p2589_p3 = scmp.lt.s32.totalorder %s2580_s15, %s2580_s15 }
  0x32   : > { %p2583_p0 = pnand %p2581_p13, %p2519_p12  ;;  %p2590_p7 = por %p2589_p3, %p2588_p10 }
  0x34   : > { %p2584_p5 = pneg %p2583_p0 }
  0x36   : > { %p2591_p9 = pnand %p2590_p7, %p2584_p5 }
  0x38   : > { %2594 = shalt.err (!%p2591_p9)
}
  0x39   : > { %2407 = dma.hbm_to_vmem [thread:$0]  (!%p2798_p11), %s3909_s5, 1024, %s253_s11, [#allocation10], %s2699_s16, %s2699_s16, %s2700_s17  }
  0x3a   : > { %s29_s19 = ssub.s32 %s2695_s27, %s2827_s13  ;;  %s32_s12 = sadd.s32 1, %s2691_s26 }
  0x3b   : > { %p30_p12 = scmp.eq.s32.totalorder %s29_s19, 0  ;;  %p39_p13 = scmp.ne.s32.totalorder %s2691_s26, %s2687_s25 }
  0x3c   : > { %p40_p0 = scmp.eq.s32.totalorder %s2695_s27, 0  ;;  %p2419_p5 = scmp.lt.s32.totalorder %s2695_s27, 2 }
  0x3d   : > { %s2848_s20 = scalar_select %p30_p12, %s2691_s26, %s32_s12  }
  0x3e   : > { %p41_p10 = por %p40_p0, %p39_p13  ;;  %p2852_p3 = por %p195_p2, %p39_p13 }
  0x3f   : > { %s269_s29 = sand.u32 1, %s2691_s26   ;;  %s2236_s10 = sshll.u32 %s2695_s27, 12 }
  0x40   : > { %s3924_s23 = scalar_select %p2852_p3, 1, 0 }
  0x41   : > { %s2202_s15 = sshll.u32 %s269_s29, 8  ;;  %s2861_s16 = scalar_lea.hbm %s3904_s0, %s2236_s10 }
  0x42   : > { %s273_s17 = scalar_lea.vmem [#allocation3], %s2202_s15  ;;  %p2863_p11 = pnand %p2419_p5, %p41_p10 }
  0x43   : > { %s280_s11 = sshll.u32 %s273_s17, 4  ;;  %s2869_s12 = scalar_lea.sflag [#allocation4], %s269_s29  ;;  %s2867_s11 = int_to_ptr.vmem [resolvable:$true] %s280_s11 }
  0x44   : > { %s2595_s21 = scalar_lea.hbm %s2861_s16, 4096  ;;  %p2597_p7 = pneg %p2863_p11 }
  0x45   : > { %p2596_p2 = scmp.ne.s32.totalorder %s2861_s16, %s2595_s21  ;;  %s2600_s15 = scalar_lea.hbm %s3904_s0, 8192 }
  0x46   : > { %p2601_p13 = scmp.lt.s32.totalorder %s2861_s16, %s3904_s0  ;;  %p2602_p0 = scmp.lt.s32.totalorder %s2600_s15, %s2595_s21 }
  0x47   : > { %p2598_p9 = pnand %p2597_p7, %p2596_p2 }
  0x48   : > { %p2603_p5 = por %p2602_p0, %p2601_p13 }
  0x49   : > { %p2599_p12 = pneg %p2598_p9 }
  0x4b   : > { %p2604_p10 = pnand %p2603_p5, %p2599_p12 }
  0x4d   : > { %2607 = shalt.err (!%p2604_p10)
}
  0x4e   : > { %s2608_s29 = scalar_lea.vmem %s2867_s11, 4096  ;;  %s2704_s22 = smov [#allocation3]  }
  0x4f   : > { %p2609_p1 = scmp.ne.s32.totalorder %s2867_s11, %s2608_s29  ;;  %s2613_s1 = sshll.u32 %s2704_s22, 4  ;;  %s2614_s1 = int_to_ptr.vmem [resolvable:$false] %s2613_s1 }
  0x50   : > { %s2615_s10 = scalar_lea.vmem %s2614_s1, 8192  ;;  %p2616_p9 = scmp.lt.s32.totalorder %s2867_s11, %s2614_s1 }
  0x51   : > { %p2611_p6 = pnand %p2609_p1, %p2597_p7  ;;  %p2617_p3 = scmp.lt.s32.totalorder %s2615_s10, %s2608_s29 }
  0x53   : > { %p2612_p2 = pneg %p2611_p6  ;;  %p2618_p4 = por %p2617_p3, %p2616_p9 }
  0x55   : > { %p2619_p8 = pnand %p2618_p4, %p2612_p2 }
  0x57   : > { %2622 = shalt.err (!%p2619_p8)
}
  0x58   : > { %s3926_s21 = smov 8   ;;  %s3927_s14 = smov 128  }
  0x59   : > { %2411 = dma.hbm_to_vmem [thread:$0]  (!%p2863_p11), %s2861_s16, 4096, %s2867_s11, %s2869_s12, %s3927_s14, %s3927_s14, %s3926_s21  }
  0x5a   : > { %p3928_p1 = scmp.ne.s32.totalorder %s3921_s9, 0 }
  0x5b   : > { %s2896_s22 = sand.u32 (!%p3928_p1), 1, %s2687_s25   ;;  %p3929_p4 = scmp.ne.s32.totalorder (!%p3928_p1), %s3919_s30, 0 }
  0x5c   : > { %292 = sbr.rel (%p3928_p1) target bundleno = 752 (0x2f0), region = 48  ;;  %s2206_s1 = sshll.u32 (!%p3928_p1), %s2896_s22, 8 }
  0x5d   : > { %s295_s15 = scalar_lea.sflag (!%p3928_p1), [#allocation4], %s2896_s22  ;;  %s2902_s19 = scalar_lea.vmem (!%p3928_p1), [#allocation3], %s2206_s1 }
  0x61   : > { %2666 = dma.done.wait (%p3929_p4), %s295_s15, 4096  }
  0x62   : > { %2668 = vsyncadd (%p3929_p4), %s295_s15, 4294963200  ;;  %p3930_p6 = scmp.eq.s32.totalorder %s2770_s28, 0 }
  0x64   : > { %2670 = dma.done.wait (%p3930_p6), [#allocation7], 1280   ;;  %p3931_p8 = pmov %p3930_p6 }
  0x65   : > { %p3932_p3 = pmov %p3930_p6 }
  0x66   : > { %2672 = vsyncadd (%p3931_p8), [#allocation7], 4294966016 }
  0x67   : > { %2674 = dma.done.wait (%p3932_p3), [#allocation10], 1024   ;;  %p3933_p11 = pmov %p3932_p3 }
  0x68   : > { %v2466_v0 = vld [vmem:[#allocation6 + $0x38] sm:$0xff]   ;;  %v2467_v1 = vld [vmem:[#allocation6 + $0x30] sm:$0xff]   ;;  %v2468_v2 = vld [vmem:[#allocation6 + $0x28] sm:$0xff]   ;;  %v2705_v56 = vmov 0.0   ;;  %s3759_s10 = scalar_lea.vmem [#allocation11], %s2206_s1  ;;  %s2237_s21 = sshll.u32 %s2770_s28, 12 }
  0x69   : > { %2676 = vsyncadd (%p3933_p11), [#allocation10], 4294966272  ;;  %2286 = vmatprep.subr.bf16.mxu0 %v2466_v0  ;;  %v2469_v3 = vld [vmem:[#allocation6 + $0x20] sm:$0xff]   ;;  %v343_v5 = vld [vmem:[%s2902_s19 + $0x8] sm:$0xff]  ;;  %686 = vst [vmem:[#allocation2] sm:$0xff] %v2705_v56  ;;  %s2094_s14 = sshll.u32 %s3759_s10, 4  ;;  %s3856_s30 = scalar_lea.hbm %s3911_s7, %s2237_s21  ;;  %s3858_s14 = int_to_ptr.vmem [resolvable:$true] %s2094_s14 }
  0x6a   : > { %2287 = vmatpush3.bf16.msra.mxu0 %v2466_v0  ;;  %v342_v4 = vld [vmem:[%s2902_s19] sm:$0xff]  ;;  %v2470_v7 = vld [vmem:[#allocation6 + $0x18] sm:$0xff]   ;;  %v2471_v8 = vld [vmem:[#allocation6 + $0x10] sm:$0xff]   ;;  %687 = vst [vmem:[#allocation2 + $0x8] sm:$0xff] %v2705_v56  ;;  %s2081_s28 = scalar_lea.sflag [#allocation5], %s2896_s22  ;;  %s2623_s9 = scalar_lea.vmem %s3858_s14, 4096 }
  0x6b   : > { %2288 = vmatprep.subr.bf16.mxu0 %v2467_v1  ;;  %v374_v6 = vpack.c.bf16 %v343_v5, %v342_v4  ;;  %v2472_v9 = vld [vmem:[#allocation6 + $0x8] sm:$0xff]   ;;  %v2473_v10 = vld [vmem:[#allocation6] sm:$0xff]   ;;  %v344_v11 = vld [vmem:[%s2902_s19 + $0x10] sm:$0xff]  ;;  %688 = vst [vmem:[#allocation2 + $0x10] sm:$0x3] %v2705_v56  ;;  %p2624_p7 = scmp.ne.s32.totalorder %s3858_s14, %s2623_s9  ;;  %p3934_p12 = scmp.ne.s32.totalorder %s3924_s23, 0 }
  0x6c   : > { %v345_v12 = vld [vmem:[%s2902_s19 + $0x18] sm:$0xff]  ;;  %v346_v13 = vld [vmem:[%s2902_s19 + $0x20] sm:$0xff]  ;;  %v347_v14 = vld [vmem:[%s2902_s19 + $0x28] sm:$0xff]  ;;  %694 = vst [vmem:[#allocation2 + $0x18] sm:$0x1] %v2705_v56  ;;  %s2706_s16 = smov [#allocation11]  }
  0x6d   : > { %2302 = vmatprep.mubr.bf16.mxu0 %v374_v6  ;;  %v375_v15 = vpack.c.bf16 %v345_v12, %v344_v11  ;;  %v376_v16 = vpack.c.bf16 %v347_v14, %v346_v13  ;;  %v348_v17 = vld [vmem:[%s2902_s19 + $0x30] sm:$0xff]  ;;  %v349_v18 = vld [vmem:[%s2902_s19 + $0x38] sm:$0xff]  ;;  %v350_v19 = vld [vmem:[%s2902_s19 + $0x40] sm:$0xff]  ;;  %695 = vst [vmem:[#allocation2 + $0x30] sm:$0x1] %v2705_v56  ;;  %p2625_p13 = pnand %p2624_p7, %p3934_p12  ;;  %s2627_s11 = sshll.u32 %s2706_s16, 4  ;;  %s2628_s11 = int_to_ptr.vmem [resolvable:$false] %s2627_s11 }
  0x6e   : > { %2289 = vmatpush3.bf16.msra.mxu0 %v2467_v1  ;;  %v351_v20 = vld [vmem:[%s2902_s19 + $0x48] sm:$0xff]  ;;  %v377_v21 = vpack.c.bf16 %v349_v18, %v348_v17  ;;  %v352_v23 = vld [vmem:[%s2902_s19 + $0x50] sm:$0xff]  ;;  %v353_v24 = vld [vmem:[%s2902_s19 + $0x58] sm:$0xff]  ;;  %712 = vst [vmem:[#allocation2 + $0x29] sm:$0x1] %v2705_v56  ;;  %v796_v1 = vlaneseq  ;;  %s2629_s12 = scalar_lea.vmem %s2628_s11, 8192  ;;  %p2630_p5 = scmp.lt.s32.totalorder %s3858_s14, %s2628_s11 }
  0x6f   : > { %2290 = vmatprep.subr.bf16.mxu0 %v2468_v2  ;;  %v378_v22 = vpack.c.bf16 %v351_v20, %v350_v19  ;;  %v354_v25 = vld [vmem:[%s2902_s19 + $0x60] sm:$0xff]  ;;  %v355_v26 = vld [vmem:[%s2902_s19 + $0x68] sm:$0xff]  ;;  %v379_v27 = vpack.c.bf16 %v353_v24, %v352_v23  ;;  %v356_v29 = vld [vmem:[%s2902_s19 + $0x70] sm:$0xff]  ;;  %713 = vst [vmem:[#allocation2 + $0x41] sm:$0x1] %v2705_v56  ;;  %p2626_p0 = pneg %p2625_p13  ;;  %p2631_p10 = scmp.lt.s32.totalorder %s2629_s12, %s2623_s9 }
  0x70   : > { %v380_v28 = vpack.c.bf16 %v355_v26, %v354_v25  ;;  %v357_v30 = vld [vmem:[%s2902_s19 + $0x78] sm:$0xff]  ;;  %v358_v31 = vld [vmem:[%s2902_s19 + $0x80] sm:$0xff]  ;;  %v359_v32 = vld [vmem:[%s2902_s19 + $0x88] sm:$0xff]  ;;  %690 = vst [vmem:[#allocation2 + $0x198] sm:$0xff] %v2705_v56 }
  0x71   : > { %v381_v33 = vpack.c.bf16 %v357_v30, %v356_v29  ;;  %v382_v34 = vpack.c.bf16 %v359_v32, %v358_v31  ;;  %v360_v35 = vld [vmem:[%s2902_s19 + $0x90] sm:$0xff]  ;;  %v361_v36 = vld [vmem:[%s2902_s19 + $0x98] sm:$0xff]  ;;  %v362_v37 = vld [vmem:[%s2902_s19 + $0xa0] sm:$0xff]  ;;  %691 = vst [vmem:[#allocation2 + $0x1a0] sm:$0xff] %v2705_v56  ;;  %p2632_p2 = por %p2631_p10, %p2630_p5 }
  0x72   : > { %2291 = vmatpush3.bf16.msra.mxu0 %v2468_v2  ;;  %v363_v38 = vld [vmem:[%s2902_s19 + $0xa8] sm:$0xff]  ;;  %v383_v39 = vpack.c.bf16 %v361_v36, %v360_v35  ;;  %v364_v41 = vld [vmem:[%s2902_s19 + $0xb0] sm:$0xff]  ;;  %v365_v42 = vld [vmem:[%s2902_s19 + $0xb8] sm:$0xff]  ;;  %692 = vst [vmem:[#allocation2 + $0x1a8] sm:$0x3] %v2705_v56  ;;  %v797_v2 = vshrl.u32 %v796_v1, 7 }
  0x73   : > { %2292 = vmatprep.subr.bf16.mxu0 %v2469_v3  ;;  %v384_v40 = vpack.c.bf16 %v363_v38, %v362_v37  ;;  %v366_v43 = vld [vmem:[%s2902_s19 + $0xc0] sm:$0xff]  ;;  %v367_v44 = vld [vmem:[%s2902_s19 + $0xc8] sm:$0xff]  ;;  %v385_v45 = vpack.c.bf16 %v365_v42, %v364_v41  ;;  %v368_v47 = vld [vmem:[%s2902_s19 + $0xd0] sm:$0xff]  ;;  %696 = vst [vmem:[#allocation2 + $0x48] sm:$0x1] %v2705_v56  ;;  %p2633_p9 = pnand %p2632_p2, %p2626_p0 }
  0x74   : > { %v386_v46 = vpack.c.bf16 %v367_v44, %v366_v43  ;;  %v369_v48 = vld [vmem:[%s2902_s19 + $0xd8] sm:$0xff]  ;;  %v370_v49 = vld [vmem:[%s2902_s19 + $0xe0] sm:$0xff]  ;;  %v371_v50 = vld [vmem:[%s2902_s19 + $0xe8] sm:$0xff]  ;;  %697 = vst [vmem:[#allocation2 + $0x60] sm:$0x1] %v2705_v56  ;;  %v898_v4 = vsub.s32 1, %v797_v2 }
  0x75   : > { %v387_v51 = vpack.c.bf16 %v369_v48, %v368_v47  ;;  %v388_v52 = vpack.c.bf16 %v371_v50, %v370_v49  ;;  %v372_v53 = vld [vmem:[%s2902_s19 + $0xf0] sm:$0xff]  ;;  %v373_v54 = vld [vmem:[%s2902_s19 + $0xf8] sm:$0xff]  ;;  %698 = vst [vmem:[#allocation2 + $0x78] sm:$0x1] %v2705_v56  ;;  %699 = vst [vmem:[#allocation2 + $0x90] sm:$0x1] %v2705_v56 }
  0x76   : > { %2293 = vmatpush3.bf16.msra.mxu0 %v2469_v3  ;;  %v389_v55 = vpack.c.bf16 %v373_v54, %v372_v53  ;;  %700 = vst [vmem:[#allocation2 + $0xa8] sm:$0x1] %v2705_v56  ;;  %701 = vst [vmem:[#allocation2 + $0xc0] sm:$0x1] %v2705_v56  ;;  %v2474_v57 = vld [vmem:[#allocation9 + $0x38] sm:$0xff]   ;;  %v2475_v58 = vld [vmem:[#allocation9 + $0x30] sm:$0xff]  }
  0x77   : > { %2294 = vmatprep.subr.bf16.mxu0 %v2470_v7  ;;  %702 = vst [vmem:[#allocation2 + $0xd8] sm:$0x1] %v2705_v56  ;;  %703 = vst [vmem:[#allocation2 + $0xf0] sm:$0x1] %v2705_v56  ;;  %2334 = vmatprep.subr.bf16.mxu1 %v2474_v57  ;;  %v2476_v59 = vld [vmem:[#allocation9 + $0x28] sm:$0xff]   ;;  %v2477_v60 = vld [vmem:[#allocation9 + $0x20] sm:$0xff]  }
  0x78   : > { %704 = vst [vmem:[#allocation2 + $0x108] sm:$0x1] %v2705_v56  ;;  %705 = vst [vmem:[#allocation2 + $0x120] sm:$0x1] %v2705_v56  ;;  %2335 = vmatpush3.bf16.msra.mxu1 %v2474_v57  ;;  %v2478_v61 = vld [vmem:[#allocation9 + $0x18] sm:$0xff]   ;;  %v2479_v62 = vld [vmem:[#allocation9 + $0x10] sm:$0xff]  }
  0x79   : > { %706 = vst [vmem:[#allocation2 + $0x138] sm:$0x1] %v2705_v56  ;;  %707 = vst [vmem:[#allocation2 + $0x150] sm:$0x1] %v2705_v56  ;;  %2336 = vmatprep.subr.bf16.mxu1 %v2475_v58  ;;  %v2480_v63 = vld [vmem:[#allocation9 + $0x8] sm:$0xff]   ;;  %v2481_v0 = vld [vmem:[#allocation9] sm:$0xff]  }
  0x7a   : > { %2295 = vmatpush3.bf16.msra.mxu0 %v2470_v7  ;;  %708 = vst [vmem:[#allocation2 + $0x168] sm:$0x1] %v2705_v56  ;;  %709 = vst [vmem:[#allocation2 + $0x180] sm:$0x1] %v2705_v56  ;;  %v798_v3 = vsub.s32 0, %v797_v2  ;;  %v762_v5 = vld [vmem:[#allocation8] sm:$0xff] }
  0x7b   : > { %2296 = vmatprep.subr.bf16.mxu0 %v2471_v8  ;;  %714 = vst [vmem:[#allocation2 + $0x59] sm:$0x1] %v2705_v56  ;;  %715 = vst [vmem:[#allocation2 + $0x71] sm:$0x1] %v2705_v56  ;;  %v2953_v7 = vld [vmem:[%s3906_s2] ss:$0 sm:$0xff]  ;;  %v2955_v12 = vrot.slane %v762_v5, %v898_v4 }
  0x7c   : > { %716 = vst [vmem:[#allocation2 + $0x89] sm:$0x1] %v2705_v56  ;;  %717 = vst [vmem:[#allocation2 + $0xa1] sm:$0x1] %v2705_v56  ;;  %2337 = vmatpush3.bf16.msra.mxu1 %v2475_v58  ;;  %v2948_v6 = vrot.slane %v762_v5, %v798_v3  ;;  %v865_v11 = vld [vmem:[#allocation2 + $0x9] sm:$0xff]  ;;  %v1499_v25 = vsub.s32 7, %v797_v2 }
  0x7d   : > { %718 = vst [vmem:[#allocation2 + $0xb9] sm:$0x1] %v2705_v56  ;;  %719 = vst [vmem:[#allocation2 + $0xd1] sm:$0x1] %v2705_v56  ;;  %2338 = vmatprep.subr.bf16.mxu1 %v2476_v59  ;;  %v901_v19 = vmul.f32 %v2955_v12, %v865_v11  ;;  %v964_v23 = vld [vmem:[#allocation2 + $0x2] sm:$0xff]  ;;  %v1399_v29 = vsub.s32 6, %v797_v2 }
  0x7e   : > { %2297 = vmatpush3.bf16.msra.mxu0 %v2471_v8  ;;  %720 = vst [vmem:[#allocation2 + $0xe9] sm:$0x1] %v2705_v56  ;;  %721 = vst [vmem:[#allocation2 + $0x101] sm:$0x1] %v2705_v56  ;;  %v801_v18 = vmul.f32 0.0, %v2948_v6  ;;  %v1298_v38 = vsub.s32 5, %v797_v2  ;;  %v2969_v42 = vrot.slane %v762_v5, %v1499_v25 }
  0x7f   : > { %2298 = vmatprep.subr.bf16.mxu0 %v2472_v9  ;;  %722 = vst [vmem:[#allocation2 + $0x119] sm:$0x1] %v2705_v56  ;;  %723 = vst [vmem:[#allocation2 + $0x131] sm:$0x1] %v2705_v56  ;;  %v2980_v53 = vrot.slane %v762_v5, %v1399_v29 }
  0x80   : > { %724 = vst [vmem:[#allocation2 + $0x149] sm:$0x1] %v2705_v56  ;;  %725 = vst [vmem:[#allocation2 + $0x161] sm:$0x1] %v2705_v56  ;;  %2339 = vmatpush3.bf16.msra.mxu1 %v2476_v59  ;;  %v933_v35 = vadd.f32 %v901_v19, %v801_v18 }
  0x81   : > { %726 = vst [vmem:[#allocation2 + $0x179] sm:$0x1] %v2705_v56  ;;  %727 = vst [vmem:[#allocation2 + $0x191] sm:$0x1] %v2705_v56  ;;  %2340 = vmatprep.subr.bf16.mxu1 %v2477_v60 }
  0x82   : > { %2299 = vmatpush3.bf16.msra.mxu0 %v2472_v9  ;;  %693 = vst [vmem:[#allocation2] sm:$0x1] %v2705_v56  ;;  %711 = vst [vmem:[#allocation2 + $0x11] sm:$0x1] %v2705_v56  ;;  %v864_v9 = vld [vmem:[#allocation2 + $0x1] sm:$0xff] }
  0x83   : > { %2300 = vmatprep.subr.bf16.mxu0 %v2473_v10  ;;  %710 = vst [vmem:[#allocation2 + $0x198] sm:$0x1] %v2705_v56  ;;  %728 = vst [vmem:[#allocation2 + $0x1a9] sm:$0x1] %v2705_v56 }
  0x84   : > { %2341 = vmatpush3.bf16.msra.mxu1 %v2477_v60 }
  0x85   : > { %2342 = vmatprep.subr.bf16.mxu1 %v2478_v61 }
  0x86   : > { %2301 = vmatpush3.bf16.msra.mxu0 %v2473_v10  ;;  %v998_v10 = vsub.s32 2, %v797_v2 }
  0x88   : > { %2343 = vmatpush3.bf16.msra.mxu1 %v2478_v61  ;;  %v2962_v20 = vrot.slane %v762_v5, %v998_v10 }
  0x89   : > { %2303 = vmatmul.mubr.bf16.vlgmr.msra.gmra.mxu0 %v375_v15  ;;  %2344 = vmatprep.subr.bf16.mxu1 %v2479_v62  ;;  %v764_v8 = vld [vmem:[#allocation2] sm:$0xff]  ;;  %v965_v24 = vld [vmem:[#allocation2 + $0xa] sm:$0xff] }
  0x8a   : > { %2306 = vmatprep.mubr.bf16.mxu0 %v376_v16  ;;  %v800_v15 = vmul.f32 %v2948_v6, %v764_v8  ;;  %v900_v16 = vmul.f32 %v2955_v12, %v864_v9  ;;  %v1000_v36 = vmul.f32 %v2962_v20, %v964_v23  ;;  %v1001_v37 = vmul.f32 %v2962_v20, %v965_v24 }
  0x8c   : > { %2345 = vmatpush3.bf16.msra.mxu1 %v2479_v62 }
  0x8d   : > { %2346 = vmatprep.subr.bf16.mxu1 %v2480_v63 }
  0x90   : > { %2347 = vmatpush3.bf16.msra.mxu1 %v2480_v63 }
  0x91   : > { %2307 = vmatmul.mubr.bf16.gmra.mxu0 %v377_v21  ;;  %2348 = vmatprep.subr.bf16.mxu1 %v2481_v0 }
  0x92   : > { %2310 = vmatprep.mubr.bf16.mxu0 %v378_v22 }
  0x94   : > { %2349 = vmatpush3.bf16.msra.mxu1 %v2481_v0 }
  0x99   : > { %2311 = vmatmul.mubr.bf16.gmra.mxu0 %v379_v27  ;;  %v1098_v27 = vsub.s32 3, %v797_v2 }
  0x9a   : > { %2314 = vmatprep.mubr.bf16.mxu0 %v380_v28  ;;  %v1198_v28 = vsub.s32 4, %v797_v2 }
  0x9b   : > { %v2974_v48 = vrot.slane %v762_v5, %v1098_v27 }
  0x9c   : > { %v2971_v44 = vrot.slane %v762_v5, %v1198_v28 }
  0xa1   : > { %2315 = vmatmul.mubr.bf16.gmra.mxu0 %v381_v33  ;;  %v932_v33 = vadd.f32 %v900_v16, %v800_v15 }
  0xa2   : > { %2318 = vmatprep.mubr.bf16.mxu0 %v382_v34 }
  0xa3   : > { %v1032_v50 = vadd.f32 %v1000_v36, %v932_v33 }
  0xa9   : > { %2319 = vmatmul.mubr.bf16.gmra.mxu0 %v383_v39 }
  0xaa   : > { %2322 = vmatprep.mubr.bf16.mxu0 %v384_v40 }
  0xb1   : > { %2323 = vmatmul.mubr.bf16.gmra.mxu0 %v385_v45 }
  0xb2   : > { %2326 = vmatprep.mubr.bf16.mxu0 %v386_v46 }
  0xb9   : > { %2327 = vmatmul.mubr.bf16.gmra.mxu0 %v387_v51  ;;  %v2976_v51 = vadd.f32 %v1001_v37, %v933_v35 }
  0xba   : > { %2330 = vmatprep.mubr.bf16.mxu0 %v388_v52  ;;  %v2978_v52 = vrot.slane %v762_v5, %v1298_v38 }
  0xc1   : > { %2331 = vmatmul.mubr.bf16.gmra.mxu0 %v389_v55 }
 0x149   : > { %v2304_v13 = vpop.f32.mrf.mxu0 }
 0x14a   : > { %v504_v14 = vadd.f32 %v2304_v13, %v2953_v7 }
 0x14b   : > { %v495_v17 = vpop.f32.mrf.mxu0 }
 0x14c   : > { %v624_v21 = vmax.f32 %v504_v14, 0.0  ;;  %v496_v22 = vadd.f32 %v2953_v7, %v495_v17 }
 0x14d   : > { %v2305_v26 = vpop.f32.mrf.mxu0 }
 0x14e   : > { %v656_v30 = vmin.f32 %v624_v21, 6.0  ;;  %v622_v31 = vmax.f32 %v496_v22, 0.0  ;;  %v507_v32 = vadd.f32 %v2305_v26, %v2953_v7  ;;  %v3029_v26 = vld [vmem:[#allocation8 + $0x8] ss:$0 sm:$0xff] }
 0x14f   : > { %v498_v34 = vpop.f32.mrf.mxu0 }
 0x150   : > { %732 = vst [vmem:[#allocation2 + $0x31] sm:$0xff] %v656_v30  ;;  %v654_v39 = vmin.f32 %v622_v31, 6.0  ;;  %v625_v40 = vmax.f32 %v507_v32, 0.0  ;;  %v499_v41 = vadd.f32 %v2953_v7, %v498_v34  ;;  %v2984_v57 = vmul.f32 %v2969_v42, %v656_v30 }
 0x151   : > { %v2308_v43 = vpop.f32.mrf.mxu0  ;;  %v2989_v61 = vmul.f32 %v2971_v44, %v656_v30  ;;  %v904_v62 = vmul.f32 %v2955_v12, %v656_v30 }
 0x152   : > { %730 = vst [vmem:[#allocation2 + $0x19] sm:$0xff] %v654_v39  ;;  %v657_v45 = vmin.f32 %v625_v40, 6.0  ;;  %v623_v46 = vmax.f32 %v499_v41, 0.0  ;;  %v520_v47 = vadd.f32 %v2308_v43, %v2953_v7  ;;  %v1200_v59 = vmul.f32 %v2971_v44, %v654_v39 }
 0x153   : > { %v511_v49 = vpop.f32.mrf.mxu0  ;;  %v902_v60 = vmul.f32 %v2955_v12, %v654_v39 }
 0x154   : > { %733 = vst [vmem:[#allocation2 + $0x39] sm:$0xff] %v657_v45  ;;  %v655_v54 = vmin.f32 %v623_v46, 6.0  ;;  %v628_v55 = vmax.f32 %v520_v47, 0.0  ;;  %v512_v56 = vadd.f32 %v2953_v7, %v511_v49  ;;  %v2996_v2 = vmul.f32 %v2969_v42, %v657_v45 }
 0x155   : > { %v2309_v58 = vpop.f32.mrf.mxu0  ;;  %v3003_v9 = vmul.f32 %v2971_v44, %v657_v45  ;;  %v3006_v10 = vmul.f32 %v2955_v12, %v657_v45 }
 0x156   : > { %731 = vst [vmem:[#allocation2 + $0x21] sm:$0xff] %v655_v54  ;;  %v2992_v63 = vmin.f32 %v628_v55, 6.0  ;;  %v626_v0 = vmax.f32 %v512_v56, 0.0  ;;  %v523_v1 = vadd.f32 %v2309_v58, %v2953_v7  ;;  %v2999_v4 = vmul.f32 %v2971_v44, %v655_v54 }
 0x157   : > { %v514_v3 = vpop.f32.mrf.mxu0  ;;  %v1365_v5 = vld [vmem:[#allocation2 + $0x30] sm:$0xff]  ;;  %v903_v8 = vmul.f32 %v2955_v12, %v655_v54 }
 0x158   : > { %736 = vst [vmem:[#allocation2 + $0x61] sm:$0xff] %v2992_v63  ;;  %v3009_v11 = vmin.f32 %v626_v0, 6.0  ;;  %v629_v13 = vmax.f32 %v523_v1, 0.0  ;;  %v515_v14 = vadd.f32 %v2953_v7, %v514_v3  ;;  %v1401_v15 = vmul.f32 %v2980_v53, %v1365_v5 }
 0x159   : > { %v2312_v16 = vpop.f32.mrf.mxu0  ;;  %v1064_v17 = vld [vmem:[#allocation2 + $0x18] sm:$0xff]  ;;  %v3014_v18 = vmul.f32 %v1365_v5, %v2974_v48  ;;  %v804_v19 = vmul.f32 %v1365_v5, %v2948_v6  ;;  %v3019_v21 = vmul.f32 %v2969_v42, %v2992_v63  ;;  %v3023_v22 = vmul.f32 %v2971_v44, %v2992_v63 }
 0x15a   : > { %734 = vst [vmem:[#allocation2 + $0x49] sm:$0xff] %v3009_v11  ;;  %v3026_v23 = vmin.f32 %v629_v13, 6.0  ;;  %v627_v24 = vmax.f32 %v515_v14, 0.0  ;;  %v536_v25 = vadd.f32 %v2312_v16, %v2953_v7  ;;  %v1100_v27 = vmul.f32 %v2974_v48, %v1064_v17 }
 0x15b   : > { %v527_v28 = vpop.f32.mrf.mxu0  ;;  %v3032_v29 = vld [vmem:[#allocation2 + $0x38] sm:$0xff]  ;;  %v802_v32 = vmul.f32 %v1064_v17, %v2948_v6  ;;  %v3041_v33 = vmul.f32 %v2969_v42, %v3009_v11  ;;  %v3043_v34 = vadd.f32 %v904_v62, %v804_v19  ;;  %v3047_v35 = vmul.f32 %v2971_v44, %v3009_v11 }
 0x15c   : > { %v3034_v30 = vld [vmem:[#allocation2 + $0x32] sm:$0xff]  ;;  %v3036_v31 = vld [vmem:[#allocation2 + $0x3a] sm:$0xff]  ;;  %737 = vst [vmem:[#allocation2 + $0x69] sm:$0xff] %v3026_v23  ;;  %v3050_v36 = vmin.f32 %v627_v24, 6.0  ;;  %v632_v37 = vmax.f32 %v536_v25, 0.0  ;;  %v528_v38 = vadd.f32 %v2953_v7, %v527_v28  ;;  %v1132_v39 = vadd.f32 %v1100_v27, %v1032_v50 }
 0x15d   : > { %v2313_v40 = vpop.f32.mrf.mxu0  ;;  %v1065_v41 = vld [vmem:[#allocation2 + $0x20] sm:$0xff]  ;;  %v1402_v46 = vmul.f32 %v2980_v53, %v3032_v29  ;;  %v1601_v47 = vmul.f32 %v3029_v26, %v3034_v30  ;;  %v3059_v49 = vmul.f32 %v3029_v26, %v3036_v31  ;;  %v934_v54 = vadd.f32 %v902_v60, %v802_v32 }
 0x15e   : > { %v1264_v43 = vld [vmem:[#allocation2 + $0x1a] sm:$0xff]  ;;  %v1265_v45 = vld [vmem:[#allocation2 + $0x22] sm:$0xff]  ;;  %735 = vst [vmem:[#allocation2 + $0x51] sm:$0xff] %v3050_v36  ;;  %v3062_v55 = vmin.f32 %v632_v37, 6.0  ;;  %v630_v50 = vmax.f32 %v528_v38, 0.0  ;;  %v539_v56 = vadd.f32 %v2313_v40, %v2953_v7  ;;  %v1101_v58 = vmul.f32 %v2974_v48, %v1065_v41 }
 0x15f   : > { %v530_v62 = vpop.f32.mrf.mxu0  ;;  %v1232_v0 = vadd.f32 %v1200_v59, %v1132_v39  ;;  %v1300_v1 = vmul.f32 %v2978_v52, %v1264_v43  ;;  %v1301_v3 = vmul.f32 %v2978_v52, %v1265_v45  ;;  %v803_v5 = vmul.f32 %v1065_v41, %v2948_v6 }
 0x160   : > { %740 = vst [vmem:[#allocation2 + $0x91] sm:$0xff] %v3062_v55  ;;  %v3070_v60 = vmin.f32 %v630_v50, 6.0  ;;  %v633_v13 = vmax.f32 %v539_v56, 0.0  ;;  %v531_v14 = vadd.f32 %v2953_v7, %v530_v62  ;;  %v1133_v16 = vadd.f32 %v1101_v58, %v2976_v51 }
 0x161   : > { %v2316_v17 = vpop.f32.mrf.mxu0  ;;  %v1332_v19 = vadd.f32 %v1300_v1, %v1232_v0  ;;  %v935_v24 = vadd.f32 %v903_v8, %v803_v5  ;;  %v1002_v59 = vmul.f32 %v1264_v43, %v2962_v20  ;;  %v1003_v25 = vmul.f32 %v1265_v45, %v2962_v20 }
 0x162   : > { %738 = vst [vmem:[#allocation2 + $0x79] sm:$0xff] %v3070_v60  ;;  %v3077_v27 = vmin.f32 %v633_v13, 6.0  ;;  %v631_v28 = vmax.f32 %v531_v14, 0.0  ;;  %v552_v32 = vadd.f32 %v2316_v17, %v2953_v7  ;;  %v1233_v37 = vadd.f32 %v2999_v4, %v1133_v16  ;;  %v3098_v13 = vld [vmem:[#allocation2 + $0x48] sm:$0xff] }
 0x163   : > { %v543_v38 = vpop.f32.mrf.mxu0  ;;  %v1433_v39 = vadd.f32 %v1401_v15, %v1332_v19  ;;  %v1034_v40 = vadd.f32 %v1002_v59, %v934_v54  ;;  %v1035_v51 = vadd.f32 %v1003_v25, %v935_v24  ;;  %v1103_v8 = vmul.f32 %v3032_v29, %v2974_v48 }
 0x164   : > { %741 = vst [vmem:[#allocation2 + $0x99] sm:$0xff] %v3077_v27  ;;  %v3084_v41 = vmin.f32 %v631_v28, 6.0  ;;  %v636_v43 = vmax.f32 %v552_v32, 0.0  ;;  %v544_v45 = vadd.f32 %v2953_v7, %v543_v38  ;;  %v1333_v50 = vadd.f32 %v1301_v3, %v1233_v37  ;;  %v3096_v3 = vld [vmem:[%s3908_s4] ss:$0 sm:$0xff] }
 0x165   : > { %v2317_v56 = vpop.f32.mrf.mxu0  ;;  %v1533_v58 = vadd.f32 %v2984_v57, %v1433_v39  ;;  %v1134_v4 = vadd.f32 %v3014_v18, %v1034_v40  ;;  %v1135_v62 = vadd.f32 %v1103_v8, %v1035_v51  ;;  %v1302_v15 = vmul.f32 %v3034_v30, %v2978_v52  ;;  %v3106_v25 = vld [vmem:[#allocation2 + $0x50] sm:$0xff] }
 0x166   : > { %739 = vst [vmem:[#allocation2 + $0x81] sm:$0xff] %v3084_v41  ;;  %v668_v54 = vmin.f32 %v636_v43, 6.0  ;;  %v634_v0 = vmax.f32 %v544_v45, 0.0  ;;  %v555_v1 = vadd.f32 %v2317_v56, %v2953_v7  ;;  %v1434_v5 = vadd.f32 %v1402_v46, %v1333_v50  ;;  %v3113_v51 = vld [vmem:[#allocation2 + $0x4a] sm:$0xff] }
 0x167   : > { %v546_v57 = vpop.f32.mrf.mxu0  ;;  %v1633_v18 = vadd.f32 %v1601_v47, %v1533_v58  ;;  %v1234_v14 = vadd.f32 %v2989_v61, %v1134_v4  ;;  %v1235_v16 = vadd.f32 %v3003_v9, %v1135_v62  ;;  %v1303_v17 = vmul.f32 %v3036_v31, %v2978_v52 }
 0x168   : > { %744 = vst [vmem:[#allocation2 + $0xc1] sm:$0xff] %v668_v54  ;;  %v666_v19 = vmin.f32 %v634_v0, 6.0  ;;  %v637_v24 = vmax.f32 %v555_v1, 0.0  ;;  %v547_v46 = vadd.f32 %v2953_v7, %v546_v57  ;;  %v1534_v59 = vadd.f32 %v2996_v2, %v1434_v5 }
 0x169   : > { %v2320_v28 = vpop.f32.mrf.mxu0  ;;  %v1672_v32 = vadd.f32 %v3096_v3, %v1633_v18  ;;  %v1334_v47 = vadd.f32 %v1302_v15, %v1234_v14  ;;  %v1335_v37 = vadd.f32 %v1303_v17, %v1235_v16  ;;  %v1403_v61 = vmul.f32 %v2980_v53, %v3098_v13 }
 0x16a   : > { %742 = vst [vmem:[#allocation2 + $0xa9] sm:$0xff] %v666_v19  ;;  %v669_v9 = vmin.f32 %v637_v24, 6.0  ;;  %v635_v38 = vmax.f32 %v547_v46, 0.0  ;;  %v568_v39 = vadd.f32 %v2320_v28, %v2953_v7  ;;  %v1634_v40 = vadd.f32 %v3059_v49, %v1534_v59  ;;  %v3123_v49 = vld [vmem:[#allocation2 + $0x52] sm:$0xff] }
 0x16b   : > { %v559_v2 = vpop.f32.mrf.mxu0  ;;  %v1704_v8 = vmax.f32 %v1672_v32, 0.0  ;;  %v1404_v43 = vmul.f32 %v2980_v53, %v3106_v25  ;;  %v1435_v45 = vadd.f32 %v1403_v61, %v1334_v47  ;;  %v1504_v50 = vmul.f32 %v2969_v42, %v3050_v36 }
 0x16c   : > { %745 = vst [vmem:[#allocation2 + $0xc9] sm:$0xff] %v669_v9  ;;  %v3119_v56 = vmin.f32 %v635_v38, 6.0  ;;  %v640_v58 = vmax.f32 %v568_v39, 0.0  ;;  %v560_v4 = vadd.f32 %v2953_v7, %v559_v2  ;;  %v1673_v62 = vadd.f32 %v3096_v3, %v1634_v40 }
 0x16d   : > { %v2321_v15 = vpop.f32.mrf.mxu0  ;;  %v1736_v54 = vmin.f32 %v1704_v8, 6.0  ;;  %v1436_v0 = vadd.f32 %v1404_v43, %v1335_v37  ;;  %v1535_v1 = vadd.f32 %v3041_v33, %v1435_v45  ;;  %v1603_v5 = vmul.f32 %v3029_v26, %v3113_v51 }
 0x16e   : > { %743 = vst [vmem:[#allocation2 + $0xb1] sm:$0xff] %v3119_v56  ;;  %v672_v57 = vmin.f32 %v640_v58, 6.0  ;;  %v638_v18 = vmax.f32 %v560_v4, 0.0  ;;  %v571_v14 = vadd.f32 %v2321_v15, %v2953_v7  ;;  %v1705_v16 = vmax.f32 %v1673_v62, 0.0 }
 0x16f   : > { %v562_v17 = vpop.f32.mrf.mxu0  ;;  %v1536_v19 = vadd.f32 %v1504_v50, %v1436_v0  ;;  %v1604_v24 = vmul.f32 %v3029_v26, %v3123_v49  ;;  %v1635_v46 = vadd.f32 %v1603_v5, %v1535_v1  ;;  %v805_v59 = vmul.f32 %v3032_v29, %v2948_v6 }
 0x170   : > { %748 = vst [vmem:[#allocation2 + $0xf1] sm:$0xff] %v672_v57  ;;  %v670_v33 = vmin.f32 %v638_v18, 6.0  ;;  %v641_v28 = vmax.f32 %v571_v14, 0.0  ;;  %v563_v32 = vadd.f32 %v2953_v7, %v562_v17  ;;  %v1737_v47 = vmin.f32 %v1705_v16, 6.0  ;;  %v3150_v16 = vld [vmem:[#allocation2 + $0x60] sm:$0xff] }
 0x171   : > { %v2324_v37 = vpop.f32.mrf.mxu0  ;;  %v1636_v61 = vadd.f32 %v1604_v24, %v1536_v19  ;;  %v1674_v9 = vadd.f32 %v3096_v3, %v1635_v46  ;;  %v937_v38 = vadd.f32 %v3006_v10, %v805_v59  ;;  %v1004_v39 = vmul.f32 %v3034_v30, %v2962_v20 }
 0x172   : > { %746 = vst [vmem:[#allocation2 + $0xd9] sm:$0xff] %v670_v33  ;;  %v673_v40 = vmin.f32 %v641_v28, 6.0  ;;  %v639_v2 = vmax.f32 %v563_v32, 0.0  ;;  %v584_v29 = vadd.f32 %v2324_v37, %v2953_v7  ;;  %v1768_v8 = vpack.c.bf16 %v1737_v47, %v1736_v54  ;;  %v3158_v37 = vld [vmem:[#allocation2 + $0x68] sm:$0xff] }
 0x173   : > { %v575_v43 = vpop.f32.mrf.mxu0  ;;  %v1675_v45 = vadd.f32 %v3096_v3, %v1636_v61  ;;  %v1706_v50 = vmax.f32 %v1674_v9, 0.0  ;;  %v1005_v58 = vmul.f32 %v3036_v31, %v2962_v20  ;;  %v1036_v4 = vadd.f32 %v1004_v39, %v3043_v34  ;;  %v3160_v61 = vld [vmem:[#allocation2 + $0x62] sm:$0xff] }
 0x174   : > { %749 = vst [vmem:[#allocation2 + $0xf9] sm:$0xff] %v673_v40  ;;  %v671_v10 = vmin.f32 %v639_v2, 6.0  ;;  %v644_v62 = vmax.f32 %v584_v29, 0.0  ;;  %v576_v30 = vadd.f32 %v2953_v7, %v575_v43  ;;  %2350 = vmatprep.mubr.bf16.mxu1 %v1768_v8  ;;  %v1104_v15 = vmul.f32 %v3098_v13, %v2974_v48 }
 0x175   : > { %v2325_v0 = vpop.f32.mrf.mxu0  ;;  %v1707_v54 = vmax.f32 %v1675_v45, 0.0  ;;  %v1738_v1 = vmin.f32 %v1706_v50, 6.0  ;;  %v1037_v5 = vadd.f32 %v1005_v58, %v937_v38  ;;  %v1105_v57 = vmul.f32 %v3106_v25, %v2974_v48 }
 0x176   : > { %747 = vst [vmem:[#allocation2 + $0xe1] sm:$0xff] %v671_v10  ;;  %v676_v31 = vmin.f32 %v644_v62, 6.0  ;;  %v642_v18 = vmax.f32 %v576_v30, 0.0  ;;  %v587_v34 = vadd.f32 %v2325_v0, %v2953_v7  ;;  %v1136_v14 = vadd.f32 %v1104_v15, %v1036_v4 }
 0x177   : > { %v578_v17 = vpop.f32.mrf.mxu0  ;;  %v1739_v19 = vmin.f32 %v1707_v54, 6.0  ;;  %v1137_v24 = vadd.f32 %v1105_v57, %v1037_v5  ;;  %v1205_v46 = vmul.f32 %v2971_v44, %v3050_v36  ;;  %v1304_v59 = vmul.f32 %v3113_v51, %v2978_v52 }
 0x178   : > { %752 = vst [vmem:[#allocation2 + $0x121] sm:$0xff] %v676_v31  ;;  %v674_v33 = vmin.f32 %v642_v18, 6.0  ;;  %v645_v28 = vmax.f32 %v587_v34, 0.0  ;;  %v579_v32 = vadd.f32 %v2953_v7, %v578_v17  ;;  %v1236_v47 = vadd.f32 %v3047_v35, %v1136_v14  ;;  %v3167_v35 = vld [vmem:[#allocation2 + $0x6a] sm:$0xff] }
 0x179   : > { %v1769_v9 = vpack.c.bf16 %v1739_v19, %v1738_v1  ;;  %v2328_v38 = vpop.f32.mrf.mxu0  ;;  %v1237_v39 = vadd.f32 %v1205_v46, %v1137_v24  ;;  %v1305_v40 = vmul.f32 %v3123_v49, %v2978_v52  ;;  %v1405_v2 = vmul.f32 %v2980_v53, %v3150_v16 }
 0x17a   : > { %750 = vst [vmem:[#allocation2 + $0x109] sm:$0xff] %v674_v33  ;;  %v677_v29 = vmin.f32 %v645_v28, 6.0  ;;  %v643_v8 = vmax.f32 %v579_v32, 0.0  ;;  %v600_v43 = vadd.f32 %v2328_v38, %v2953_v7  ;;  %v1336_v45 = vadd.f32 %v1304_v59, %v1236_v47 }
 0x17b   : > { %2351 = vmatmul.mubr.bf16.vlgmr.msra.gmra.mxu1 %v1769_v9  ;;  %v591_v50 = vpop.f32.mrf.mxu0  ;;  %v1337_v58 = vadd.f32 %v1305_v40, %v1237_v39  ;;  %v1406_v4 = vmul.f32 %v2980_v53, %v3158_v37  ;;  %v1506_v10 = vmul.f32 %v2969_v42, %v3026_v23  ;;  %v1605_v62 = vmul.f32 %v3029_v26, %v3160_v61 }
 0x17c   : > { %753 = vst [vmem:[#allocation2 + $0x129] sm:$0xff] %v677_v29  ;;  %v675_v30 = vmin.f32 %v643_v8, 6.0  ;;  %v648_v15 = vmax.f32 %v600_v43, 0.0  ;;  %v592_v0 = vadd.f32 %v2953_v7, %v591_v50  ;;  %v1437_v54 = vadd.f32 %v1405_v2, %v1336_v45  ;;  %v3199_v50 = vld [vmem:[#allocation2 + $0x78] sm:$0xff] }
 0x17d   : > { %v1438_v1 = vadd.f32 %v1406_v4, %v1337_v58  ;;  %v1606_v5 = vmul.f32 %v3029_v26, %v3167_v35  ;;  %v2329_v57 = vpop.f32.mrf.mxu0  ;;  %v806_v31 = vmul.f32 %v3098_v13, %v2948_v6  ;;  %v807_v18 = vmul.f32 %v3106_v25, %v2948_v6  ;;  %v3201_v58 = vld [vmem:[#allocation2 + $0x80] sm:$0xff] }
 0x17e   : > { %751 = vst [vmem:[#allocation2 + $0x111] sm:$0xff] %v675_v30  ;;  %v680_v34 = vmin.f32 %v648_v15, 6.0  ;;  %v646_v14 = vmax.f32 %v592_v0, 0.0  ;;  %v1537_v17 = vadd.f32 %v3019_v21, %v1437_v54  ;;  %v603_v19 = vadd.f32 %v2329_v57, %v2953_v7 }
 0x17f   : > { %v1538_v24 = vadd.f32 %v1506_v10, %v1438_v1  ;;  %v594_v46 = vpop.f32.mrf.mxu0  ;;  %v906_v59 = vmul.f32 %v2955_v12, %v3009_v11  ;;  %v907_v33 = vmul.f32 %v2955_v12, %v3050_v36  ;;  %v1006_v13 = vmul.f32 %v3113_v51, %v2962_v20  ;;  %v3209_v1 = vld [vmem:[#allocation2 + $0x7a] sm:$0xff] }
 0x180   : > { %756 = vst [vmem:[#allocation2 + $0x151] sm:$0xff] %v680_v34  ;;  %v678_v25 = vmin.f32 %v646_v14, 6.0  ;;  %v1637_v28 = vadd.f32 %v1605_v62, %v1537_v17  ;;  %v649_v32 = vmax.f32 %v603_v19, 0.0  ;;  %v595_v47 = vadd.f32 %v2953_v7, %v594_v46 }
 0x181   : > { %v1638_v21 = vadd.f32 %v1606_v5, %v1538_v24  ;;  %v938_v9 = vadd.f32 %v906_v59, %v806_v31  ;;  %v939_v38 = vadd.f32 %v907_v33, %v807_v18  ;;  %v1007_v39 = vmul.f32 %v3123_v49, %v2962_v20  ;;  %v2332_v40 = vpop.f32.mrf.mxu0  ;;  %v3211_v5 = vld [vmem:[#allocation2 + $0x82] sm:$0xff] }
 0x182   : > { %754 = vst [vmem:[#allocation2 + $0x139] sm:$0xff] %v678_v25  ;;  %v1676_v11 = vadd.f32 %v3096_v3, %v1637_v28  ;;  %v681_v36 = vmin.f32 %v649_v32, 6.0  ;;  %v647_v2 = vmax.f32 %v595_v47, 0.0  ;;  %v1106_v51 = vmul.f32 %v3150_v16, %v2974_v48 }
 0x183   : > { %v1677_v29 = vadd.f32 %v3096_v3, %v1638_v21  ;;  %v1038_v8 = vadd.f32 %v1006_v13, %v938_v9  ;;  %v1039_v43 = vadd.f32 %v1007_v39, %v939_v38  ;;  %v1107_v45 = vmul.f32 %v3158_v37, %v2974_v48  ;;  %v607_v57 = vpop.f32.mrf.mxu0 }
 0x184   : > { %v1708_v49 = vmax.f32 %v1676_v11, 0.0  ;;  %757 = vst [vmem:[#allocation2 + $0x159] sm:$0xff] %v681_v36  ;;  %v679_v4 = vmin.f32 %v647_v2, 6.0  ;;  %v1207_v10 = vmul.f32 %v2971_v44, %v3026_v23  ;;  %v1306_v62 = vmul.f32 %v3160_v61, %v2978_v52 }
 0x185   : > { %v1709_v30 = vmax.f32 %v1677_v29, 0.0  ;;  %v1138_v15 = vadd.f32 %v1106_v51, %v1038_v8  ;;  %v1139_v0 = vadd.f32 %v1107_v45, %v1039_v43  ;;  %v1307_v54 = vmul.f32 %v3167_v35, %v2978_v52 }
 0x186   : > { %v1740_v31 = vmin.f32 %v1708_v49, 6.0  ;;  %755 = vst [vmem:[#allocation2 + $0x141] sm:$0xff] %v679_v4  ;;  %v1407_v18 = vmul.f32 %v2980_v53, %v3199_v50  ;;  %v1408_v34 = vmul.f32 %v2980_v53, %v3201_v58  ;;  %v1507_v14 = vmul.f32 %v2969_v42, %v3070_v60  ;;  %v3242_v49 = vld [vmem:[#allocation2 + $0x90] sm:$0xff]  ;;  %v2333_v4 = vpop.f32.mrf.mxu0 }
 0x187   : > { %v1741_v17 = vmin.f32 %v1709_v30, 6.0  ;;  %v1238_v19 = vadd.f32 %v3023_v22, %v1138_v15  ;;  %v1239_v24 = vadd.f32 %v1207_v10, %v1139_v0  ;;  %v1508_v46 = vmul.f32 %v2969_v42, %v3084_v41 }
 0x188   : > { %v1607_v59 = vmul.f32 %v3029_v26, %v3209_v1  ;;  %v1608_v33 = vmul.f32 %v3029_v26, %v3211_v5  ;;  %v616_v13 = vadd.f32 %v2332_v40, %v2953_v7  ;;  %v608_v25 = vadd.f32 %v2953_v7, %v607_v57 }
 0x189   : > { %v1770_v28 = vpack.c.bf16 %v1741_v17, %v1740_v31  ;;  %v1338_v32 = vadd.f32 %v1306_v62, %v1238_v19  ;;  %v1339_v47 = vadd.f32 %v1307_v54, %v1239_v24  ;;  %v808_v22 = vmul.f32 %v3150_v16, %v2948_v6  ;;  %v3248_v62 = vld [vmem:[#allocation2 + $0x98] sm:$0xff]  ;;  %v610_v24 = vpop.f32.mrf.mxu0 }
 0x18a   : > { %v652_v21 = vmax.f32 %v616_v13, 0.0  ;;  %v650_v9 = vmax.f32 %v608_v25, 0.0  ;;  %v809_v38 = vmul.f32 %v3158_v37, %v2948_v6  ;;  %v908_v39 = vmul.f32 %v2955_v12, %v2992_v63  ;;  %v3252_v54 = vld [vmem:[#allocation2 + $0x92] sm:$0xff] }
 0x18b   : > { %2354 = vmatprep.mubr.bf16.mxu1 %v1770_v28  ;;  %v1439_v11 = vadd.f32 %v1407_v18, %v1338_v32  ;;  %v1440_v36 = vadd.f32 %v1408_v34, %v1339_v47  ;;  %v909_v40 = vmul.f32 %v2955_v12, %v3026_v23  ;;  %v1008_v2 = vmul.f32 %v3160_v61, %v2962_v20 }
 0x18c   : > { %v684_v51 = vmin.f32 %v652_v21, 6.0  ;;  %v682_v29 = vmin.f32 %v650_v9, 6.0  ;;  %v940_v16 = vadd.f32 %v908_v39, %v808_v22  ;;  %v1009_v8 = vmul.f32 %v3167_v35, %v2962_v20  ;;  %v874_v22 = vld [vmem:[#allocation2 + $0x79] sm:$0xff] }
 0x18d   : > { %v1539_v43 = vadd.f32 %v1507_v14, %v1439_v11  ;;  %v1540_v37 = vadd.f32 %v1508_v46, %v1440_v36  ;;  %v941_v45 = vadd.f32 %v909_v40, %v809_v38  ;;  %v1108_v63 = vmul.f32 %v3199_v50, %v2974_v48 }
 0x18e   : > { %760 = vst [vmem:[#allocation2 + $0x181] sm:$0xff] %v684_v51  ;;  %758 = vst [vmem:[#allocation2 + $0x169] sm:$0xff] %v682_v29  ;;  %v1040_v23 = vadd.f32 %v1008_v2, %v940_v16  ;;  %v1109_v61 = vmul.f32 %v3201_v58, %v2974_v48  ;;  %v1208_v10 = vmul.f32 %v2971_v44, %v3070_v60  ;;  %v1574_v2 = vld [vmem:[#allocation2 + $0x9a] sm:$0xff] }
 0x18f   : > { %v1639_v35 = vadd.f32 %v1607_v59, %v1539_v43  ;;  %v1640_v30 = vadd.f32 %v1608_v33, %v1540_v37  ;;  %v1041_v15 = vadd.f32 %v1009_v8, %v941_v45  ;;  %v1209_v0 = vmul.f32 %v2971_v44, %v3084_v41  ;;  %v1174_v37 = vld [vmem:[#allocation2 + $0x91] sm:$0xff] }
 0x190   : > { %v1140_v57 = vadd.f32 %v1108_v63, %v1040_v23  ;;  %v1308_v31 = vmul.f32 %v3209_v1, %v2978_v52  ;;  %v1309_v18 = vmul.f32 %v3211_v5, %v2978_v52  ;;  %v1409_v60 = vmul.f32 %v2980_v53, %v3242_v49  ;;  %v1175_v23 = vld [vmem:[#allocation2 + $0x99] sm:$0xff] }
 0x191   : > { %v1678_v34 = vadd.f32 %v3096_v3, %v1639_v35  ;;  %v1679_v14 = vadd.f32 %v3096_v3, %v1640_v30  ;;  %v1141_v17 = vadd.f32 %v1109_v61, %v1041_v15  ;;  %v1410_v19 = vmul.f32 %v2980_v53, %v3248_v62  ;;  %v3286_v30 = vld [vmem:[#allocation2 + $0xa8] sm:$0xff] }
 0x192   : > { %v1240_v46 = vadd.f32 %v1208_v10, %v1140_v57  ;;  %v1509_v59 = vmul.f32 %v2969_v42, %v3062_v55  ;;  %v1510_v33 = vmul.f32 %v2969_v42, %v3077_v27  ;;  %v1609_v13 = vmul.f32 %v3029_v26, %v3252_v54 }
 0x193   : > { %v1710_v25 = vmax.f32 %v1678_v34, 0.0  ;;  %v1711_v28 = vmax.f32 %v1679_v14, 0.0  ;;  %v1241_v32 = vadd.f32 %v1209_v0, %v1141_v17  ;;  %v619_v47 = vadd.f32 %v2333_v4, %v2953_v7  ;;  %v3298_v17 = vld [vmem:[#allocation2 + $0xaa] sm:$0xff] }
 0x194   : > { %v1340_v21 = vadd.f32 %v1308_v31, %v1240_v46  ;;  %v611_v9 = vadd.f32 %v2953_v7, %v610_v24  ;;  %v810_v38 = vmul.f32 %v3199_v50, %v2948_v6  ;;  %v811_v55 = vmul.f32 %v3201_v58, %v2948_v6  ;;  %v3291_v31 = vld [vmem:[#allocation2 + $0xb0] sm:$0xff] }
 0x195   : > { %v1742_v39 = vmin.f32 %v1710_v25, 6.0  ;;  %v1743_v27 = vmin.f32 %v1711_v28, 6.0  ;;  %v1341_v11 = vadd.f32 %v1309_v18, %v1241_v32  ;;  %v653_v36 = vmax.f32 %v619_v47, 0.0  ;;  %v3293_v18 = vld [vmem:[#allocation2 + $0xa9] sm:$0xff] }
 0x196   : > { %v1441_v40 = vadd.f32 %v1409_v60, %v1340_v21  ;;  %v651_v51 = vmax.f32 %v611_v9, 0.0  ;;  %v910_v29 = vmul.f32 %v2955_v12, %v874_v22  ;;  %v911_v16 = vmul.f32 %v2955_v12, %v3084_v41 }
 0x197   : > { %v1771_v8 = vpack.c.bf16 %v1743_v27, %v1742_v39  ;;  %v1442_v7 = vadd.f32 %v1410_v19, %v1341_v11  ;;  %v685_v43 = vmin.f32 %v653_v36, 6.0  ;;  %v1010_v50 = vmul.f32 %v3209_v1, %v2962_v20  ;;  %v1576_v36 = vld [vmem:[#allocation2 + $0xb2] sm:$0xff] }
 0x198   : > { %v1541_v58 = vadd.f32 %v1509_v59, %v1441_v40  ;;  %v683_v45 = vmin.f32 %v651_v51, 6.0  ;;  %v942_v63 = vadd.f32 %v910_v29, %v810_v38  ;;  %v943_v4 = vadd.f32 %v911_v16, %v811_v55 }
 0x199   : > { %2355 = vmatmul.mubr.bf16.gmra.mxu1 %v1771_v8  ;;  %v1542_v61 = vadd.f32 %v1510_v33, %v1442_v7  ;;  %v1610_v10 = vmul.f32 %v3029_v26, %v1574_v2  ;;  %761 = vst [vmem:[#allocation2 + $0x189] sm:$0xff] %v685_v43  ;;  %v1011_v41 = vmul.f32 %v3211_v5, %v2962_v20 }
 0x19a   : > { %v1110_v35 = vmul.f32 %v3242_v49, %v2974_v48  ;;  %v1641_v1 = vadd.f32 %v1609_v13, %v1541_v58  ;;  %759 = vst [vmem:[#allocation2 + $0x171] sm:$0xff] %v683_v45  ;;  %v1042_v15 = vadd.f32 %v1010_v50, %v942_v63  ;;  %v1111_v0 = vmul.f32 %v3248_v62, %v2974_v48  ;;  %v1177_v50 = vld [vmem:[#allocation2 + $0xb1] sm:$0xff] }
 0x19b   : > { %v1210_v57 = vmul.f32 %v2971_v44, %v1174_v37  ;;  %v1642_v60 = vadd.f32 %v1610_v10, %v1542_v61  ;;  %v1043_v34 = vadd.f32 %v1011_v41, %v943_v4  ;;  %v1211_v5 = vmul.f32 %v2971_v44, %v1175_v23  ;;  %v3327_v4 = vld [vmem:[#allocation2 + $0xc0] sm:$0xff]  ;;  %v3331_v10 = vld [vmem:[#allocation2 + $0xc8] sm:$0xff] }
 0x19c   : > { %v1310_v14 = vmul.f32 %v3252_v54, %v2978_v52  ;;  %v1680_v19 = vadd.f32 %v3096_v3, %v1641_v1  ;;  %v1142_v24 = vadd.f32 %v1110_v35, %v1042_v15  ;;  %v1311_v46 = vmul.f32 %v1574_v2, %v2978_v52  ;;  %v3333_v41 = vld [vmem:[#allocation2 + $0xc1] sm:$0xff]  ;;  %v3335_v35 = vld [vmem:[#allocation2 + $0xc9] sm:$0xff] }
 0x19d   : > { %v1411_v59 = vmul.f32 %v2980_v53, %v3286_v30  ;;  %v1681_v33 = vadd.f32 %v3096_v3, %v1642_v60  ;;  %v1143_v13 = vadd.f32 %v1111_v0, %v1043_v34  ;;  %v1412_v25 = vmul.f32 %v2980_v53, %v3291_v31  ;;  %v3341_v60 = vld [vmem:[#allocation2 + $0xc2] sm:$0xff] }
 0x19e   : > { %v1511_v28 = vmul.f32 %v2969_v42, %v3293_v18  ;;  %v1712_v32 = vmax.f32 %v1680_v19, 0.0  ;;  %v1242_v47 = vadd.f32 %v1210_v57, %v1142_v24  ;;  %v1512_v22 = vmul.f32 %v2969_v42, %v3119_v56 }
 0x19f   : > { %v1611_v21 = vmul.f32 %v3029_v26, %v3298_v17  ;;  %v1713_v9 = vmax.f32 %v1681_v33, 0.0  ;;  %v1243_v38 = vadd.f32 %v1211_v5, %v1143_v13  ;;  %v812_v55 = vmul.f32 %v3242_v49, %v2948_v6 }
 0x1a0   : > { %v813_v39 = vmul.f32 %v3248_v62, %v2948_v6  ;;  %v1744_v27 = vmin.f32 %v1712_v32, 6.0  ;;  %v1342_v11 = vadd.f32 %v1310_v14, %v1242_v47  ;;  %v912_v40 = vmul.f32 %v1174_v37, %v2955_v12  ;;  %v3352_v32 = vld [vmem:[#allocation2 + $0xca] sm:$0xff] }
 0x1a1   : > { %v913_v51 = vmul.f32 %v1175_v23, %v2955_v12  ;;  %v1745_v29 = vmin.f32 %v1713_v9, 6.0  ;;  %v1343_v56 = vadd.f32 %v1311_v46, %v1243_v38  ;;  %v1012_v16 = vmul.f32 %v3252_v54, %v2962_v20 }
 0x1a2   : > { %v1013_v8 = vmul.f32 %v1574_v2, %v2962_v20  ;;  %v1443_v7 = vadd.f32 %v1411_v59, %v1342_v11  ;;  %v944_v43 = vadd.f32 %v912_v40, %v812_v55  ;;  %v1112_v62 = vmul.f32 %v3286_v30, %v2974_v48 }
 0x1a3   : > { %v945_v49 = vadd.f32 %v913_v51, %v813_v39  ;;  %v1772_v58 = vpack.c.bf16 %v1745_v29, %v1744_v27  ;;  %v1444_v45 = vadd.f32 %v1412_v25, %v1343_v56  ;;  %v1612_v37 = vmul.f32 %v3029_v26, %v1576_v36 }
 0x1a4   : > { %v1113_v63 = vmul.f32 %v3291_v31, %v2974_v48  ;;  %v1543_v23 = vadd.f32 %v1511_v28, %v1443_v7  ;;  %v1044_v54 = vadd.f32 %v1012_v16, %v944_v43  ;;  %v1212_v2 = vmul.f32 %v3293_v18, %v2971_v44 }
 0x1a5   : > { %v1045_v61 = vadd.f32 %v1013_v8, %v945_v49  ;;  %2358 = vmatprep.mubr.bf16.mxu1 %v1772_v58  ;;  %v1544_v1 = vadd.f32 %v1512_v22, %v1444_v45  ;;  %v1213_v15 = vmul.f32 %v2971_v44, %v1177_v50  ;;  %v1312_v0 = vmul.f32 %v3298_v17, %v2978_v52 }
 0x1a6   : > { %v1313_v57 = vmul.f32 %v1576_v36, %v2978_v52  ;;  %v1643_v34 = vadd.f32 %v1611_v21, %v1543_v23  ;;  %v1144_v5 = vadd.f32 %v1112_v62, %v1044_v54  ;;  %v1413_v19 = vmul.f32 %v2980_v53, %v3327_v4 }
 0x1a7   : > { %v1145_v14 = vadd.f32 %v1113_v63, %v1045_v61  ;;  %v1644_v24 = vadd.f32 %v1612_v37, %v1544_v1  ;;  %v1414_v46 = vmul.f32 %v2980_v53, %v3331_v10  ;;  %v1513_v59 = vmul.f32 %v2969_v42, %v3333_v41  ;;  %v3373_v37 = vld [vmem:[#allocation2 + $0xd8] sm:$0xff] }
 0x1a8   : > { %v1514_v33 = vmul.f32 %v2969_v42, %v3335_v35  ;;  %v1682_v13 = vadd.f32 %v3096_v3, %v1643_v34  ;;  %v1244_v25 = vadd.f32 %v1212_v2, %v1144_v5  ;;  %v1613_v47 = vmul.f32 %v3029_v26, %v3341_v60  ;;  %v3381_v61 = vld [vmem:[#allocation2 + $0xd9] sm:$0xff] }
 0x1a9   : > { %v1245_v28 = vadd.f32 %v1213_v15, %v1145_v14  ;;  %v1683_v22 = vadd.f32 %v3096_v3, %v1644_v24  ;;  %v814_v21 = vmul.f32 %v3286_v30, %v2948_v6  ;;  %v815_v9 = vmul.f32 %v3291_v31, %v2948_v6  ;;  %v3387_v34 = vld [vmem:[#allocation2 + $0xda] sm:$0xff] }
 0x1aa   : > { %v914_v38 = vmul.f32 %v3293_v18, %v2955_v12  ;;  %v1714_v55 = vmax.f32 %v1682_v13, 0.0  ;;  %v1344_v39 = vadd.f32 %v1312_v0, %v1244_v25  ;;  %v915_v11 = vmul.f32 %v1177_v50, %v2955_v12 }
 0x1ab   : > { %v1345_v27 = vadd.f32 %v1313_v57, %v1245_v28  ;;  %v1715_v40 = vmax.f32 %v1683_v22, 0.0  ;;  %v1614_v51 = vmul.f32 %v3029_v26, %v3352_v32  ;;  %v1014_v56 = vmul.f32 %v3298_v17, %v2962_v20  ;;  %v3375_v17 = vld [vmem:[#allocation2 + $0xe0] sm:$0xff] }
 0x1ac   : > { %v946_v29 = vadd.f32 %v914_v38, %v814_v21  ;;  %v1445_v30 = vadd.f32 %v1413_v19, %v1344_v39  ;;  %v947_v8 = vadd.f32 %v915_v11, %v815_v9  ;;  %v1015_v31 = vmul.f32 %v1576_v36, %v2962_v20  ;;  %v3385_v57 = vld [vmem:[#allocation2 + $0xe1] sm:$0xff] }
 0x1ad   : > { %v1446_v16 = vadd.f32 %v1414_v46, %v1345_v27  ;;  %v1746_v7 = vmin.f32 %v1714_v55, 6.0  ;;  %v1747_v18 = vmin.f32 %v1715_v40, 6.0  ;;  %v1114_v49 = vmul.f32 %v3327_v4, %v2974_v48  ;;  %v1580_v27 = vld [vmem:[#allocation2 + $0xe2] sm:$0xff] }
 0x1ae   : > { %v1046_v43 = vadd.f32 %v1014_v56, %v946_v29  ;;  %v1545_v62 = vadd.f32 %v1513_v59, %v1445_v30  ;;  %v1047_v58 = vadd.f32 %v1015_v31, %v947_v8  ;;  %v1115_v45 = vmul.f32 %v3331_v10, %v2974_v48 }
 0x1af   : > { %v1546_v50 = vadd.f32 %v1514_v33, %v1446_v16  ;;  %v1773_v63 = vpack.c.bf16 %v1747_v18, %v1746_v7  ;;  %v1214_v36 = vmul.f32 %v3333_v41, %v2971_v44  ;;  %v1215_v54 = vmul.f32 %v3335_v35, %v2971_v44 }
 0x1b0   : > { %v1146_v23 = vadd.f32 %v1114_v49, %v1046_v43  ;;  %v1645_v2 = vadd.f32 %v1613_v47, %v1545_v62  ;;  %v1147_v15 = vadd.f32 %v1115_v45, %v1047_v58  ;;  %v1314_v0 = vmul.f32 %v3341_v60, %v2978_v52  ;;  %v3426_v58 = vld [vmem:[#allocation2 + $0xf1] sm:$0xff]  ;;  %v3428_v45 = vld [vmem:[#allocation2 + $0xf9] sm:$0xff] }
 0x1b1   : > { %v1646_v1 = vadd.f32 %v1614_v51, %v1546_v50  ;;  %2359 = vmatmul.mubr.bf16.gmra.mxu1 %v1773_v63  ;;  %v1315_v14 = vmul.f32 %v3352_v32, %v2978_v52  ;;  %v1415_v19 = vmul.f32 %v2980_v53, %v3373_v37  ;;  %v1416_v24 = vmul.f32 %v2980_v53, %v3375_v17  ;;  %v3424_v50 = vld [vmem:[#allocation2 + $0xf8] sm:$0xff] }
 0x1b2   : > { %v1246_v5 = vadd.f32 %v1214_v36, %v1146_v23  ;;  %v1684_v46 = vadd.f32 %v3096_v3, %v1645_v2  ;;  %v1247_v33 = vadd.f32 %v1215_v54, %v1147_v15  ;;  %v1515_v13 = vmul.f32 %v2969_v42, %v3381_v61  ;;  %v3435_v2 = vld [vmem:[#allocation2 + $0xf2] sm:$0xff] }
 0x1b3   : > { %v1685_v59 = vadd.f32 %v3096_v3, %v1646_v1  ;;  %v1516_v28 = vmul.f32 %v2969_v42, %v3385_v57  ;;  %v1615_v47 = vmul.f32 %v3029_v26, %v3387_v34  ;;  %v816_v22 = vmul.f32 %v3327_v4, %v2948_v6 }
 0x1b4   : > { %v1346_v25 = vadd.f32 %v1314_v0, %v1246_v5  ;;  %v1716_v21 = vmax.f32 %v1684_v46, 0.0  ;;  %v1347_v38 = vadd.f32 %v1315_v14, %v1247_v33  ;;  %v817_v55 = vmul.f32 %v3331_v10, %v2948_v6 }
 0x1b5   : > { %v1717_v9 = vmax.f32 %v1685_v59, 0.0  ;;  %v916_v11 = vmul.f32 %v3333_v41, %v2955_v12  ;;  %v917_v40 = vmul.f32 %v3335_v35, %v2955_v12  ;;  %v1016_v51 = vmul.f32 %v3341_v60, %v2962_v20  ;;  %v3420_v60 = vld [vmem:[#allocation2 + $0xf0] sm:$0xff]  ;;  %v3447_v59 = vld [vmem:[#allocation2 + $0xfa] sm:$0xff] }
 0x1b6   : > { %v1447_v39 = vadd.f32 %v1415_v19, %v1346_v25  ;;  %v1748_v29 = vmin.f32 %v1716_v21, 6.0  ;;  %v1448_v4 = vadd.f32 %v1416_v24, %v1347_v38  ;;  %v1017_v30 = vmul.f32 %v3352_v32, %v2962_v20 }
 0x1b7   : > { %v1749_v56 = vmin.f32 %v1717_v9, 6.0  ;;  %v948_v8 = vadd.f32 %v916_v11, %v816_v22  ;;  %v949_v10 = vadd.f32 %v917_v40, %v817_v55  ;;  %v1116_v31 = vmul.f32 %v3373_v37, %v2974_v48 }
 0x1b8   : > { %v1547_v16 = vadd.f32 %v1515_v13, %v1447_v39  ;;  %v1548_v41 = vadd.f32 %v1516_v28, %v1448_v4  ;;  %v1616_v18 = vmul.f32 %v3029_v26, %v1580_v27  ;;  %v1117_v35 = vmul.f32 %v3375_v17, %v2974_v48 }
 0x1b9   : > { %v1774_v7 = vpack.c.bf16 %v1749_v56, %v1748_v29  ;;  %v1048_v49 = vadd.f32 %v1016_v51, %v948_v8  ;;  %v1049_v62 = vadd.f32 %v1017_v30, %v949_v10  ;;  %v1216_v32 = vmul.f32 %v3381_v61, %v2971_v44 }
 0x1ba   : > { %v1647_v43 = vadd.f32 %v1615_v47, %v1547_v16  ;;  %v1648_v63 = vadd.f32 %v1616_v18, %v1548_v41  ;;  %v1217_v23 = vmul.f32 %v3385_v57, %v2971_v44  ;;  %v1316_v36 = vmul.f32 %v3387_v34, %v2978_v52  ;;  %v3472_v41 = vld [vmem:[#allocation2 + $0x110] sm:$0xff] }
 0x1bb   : > { %2362 = vmatprep.mubr.bf16.mxu1 %v1774_v7  ;;  %v1317_v54 = vmul.f32 %v1580_v27, %v2978_v52  ;;  %v1148_v15 = vadd.f32 %v1116_v31, %v1048_v49  ;;  %v1149_v0 = vadd.f32 %v1117_v35, %v1049_v62  ;;  %v1417_v5 = vmul.f32 %v2980_v53, %v3420_v60  ;;  %v3474_v18 = vld [vmem:[#allocation2 + $0x109] sm:$0xff] }
 0x1bc   : > { %v1686_v1 = vadd.f32 %v3096_v3, %v1647_v43  ;;  %v1687_v14 = vadd.f32 %v3096_v3, %v1648_v63  ;;  %v1418_v19 = vmul.f32 %v2980_v53, %v3424_v50  ;;  %v1517_v24 = vmul.f32 %v2969_v42, %v3426_v58 }
 0x1bd   : > { %v1518_v46 = vmul.f32 %v2969_v42, %v3428_v45  ;;  %v1248_v13 = vadd.f32 %v1216_v32, %v1148_v15  ;;  %v1249_v25 = vadd.f32 %v1217_v23, %v1149_v0  ;;  %v1617_v28 = vmul.f32 %v3029_v26, %v3435_v2  ;;  %v3484_v32 = vld [vmem:[#allocation2 + $0x10a] sm:$0xff] }
 0x1be   : > { %v1718_v33 = vmax.f32 %v1686_v1, 0.0  ;;  %v1719_v47 = vmax.f32 %v1687_v14, 0.0  ;;  %v818_v22 = vmul.f32 %v3373_v37, %v2948_v6  ;;  %v819_v21 = vmul.f32 %v3375_v17, %v2948_v6 }
 0x1bf   : > { %v918_v9 = vmul.f32 %v3381_v61, %v2955_v12  ;;  %v1348_v38 = vadd.f32 %v1316_v36, %v1248_v13  ;;  %v1349_v55 = vadd.f32 %v1317_v54, %v1249_v25  ;;  %v1618_v39 = vmul.f32 %v3029_v26, %v3447_v59 }
 0x1c0   : > { %v919_v11 = vmul.f32 %v3385_v57, %v2955_v12  ;;  %v1750_v40 = vmin.f32 %v1718_v33, 6.0  ;;  %v1751_v51 = vmin.f32 %v1719_v47, 6.0  ;;  %v1018_v37 = vmul.f32 %v3387_v34, %v2962_v20  ;;  %v3468_v57 = vld [vmem:[#allocation2 + $0x108] sm:$0xff] }
 0x1c1   : > { %v950_v29 = vadd.f32 %v918_v9, %v818_v22  ;;  %v1449_v56 = vadd.f32 %v1417_v5, %v1348_v38  ;;  %v1450_v4 = vadd.f32 %v1418_v19, %v1349_v55  ;;  %v1019_v30 = vmul.f32 %v1580_v27, %v2962_v20  ;;  %v3476_v27 = vld [vmem:[#allocation2 + $0x111] sm:$0xff] }
 0x1c2   : > { %v951_v17 = vadd.f32 %v919_v11, %v819_v21  ;;  %v1775_v61 = vpack.c.bf16 %v1751_v51, %v1750_v40  ;;  %v1118_v8 = vmul.f32 %v3420_v60, %v2974_v48  ;;  %v1119_v26 = vmul.f32 %v3424_v50, %v2974_v48  ;;  %v1584_v55 = vld [vmem:[#allocation2 + $0x112] sm:$0xff] }
 0x1c3   : > { %v1050_v16 = vadd.f32 %v1018_v37, %v950_v29  ;;  %v1549_v10 = vadd.f32 %v1517_v24, %v1449_v56  ;;  %v1550_v31 = vadd.f32 %v1518_v46, %v1450_v4  ;;  %v1218_v34 = vmul.f32 %v3426_v58, %v2971_v44  ;;  %v3496_v46 = vld [vmem:[#allocation8 + $0x8] ss:$0 sm:$0xff] }
 0x1c4   : > { %v1051_v7 = vadd.f32 %v1019_v30, %v951_v17  ;;  %2363 = vmatmul.mubr.bf16.gmra.mxu1 %v1775_v61  ;;  %v1219_v43 = vmul.f32 %v3428_v45, %v2971_v44  ;;  %v1318_v49 = vmul.f32 %v3435_v2, %v2978_v52  ;;  %v1319_v62 = vmul.f32 %v3447_v59, %v2978_v52  ;;  %v3517_v61 = vld [vmem:[#allocation2 + $0x120] sm:$0xff] }
 0x1c5   : > { %v1150_v35 = vadd.f32 %v1118_v8, %v1050_v16  ;;  %v1649_v63 = vadd.f32 %v1617_v28, %v1549_v10  ;;  %v1650_v23 = vadd.f32 %v1618_v39, %v1550_v31  ;;  %v1419_v54 = vmul.f32 %v2980_v53, %v3468_v57  ;;  %v3525_v31 = vld [vmem:[#allocation2 + $0x121] sm:$0xff] }
 0x1c6   : > { %v1151_v36 = vadd.f32 %v1119_v26, %v1051_v7  ;;  %v1420_v15 = vmul.f32 %v2980_v53, %v3472_v41  ;;  %v1519_v0 = vmul.f32 %v2969_v42, %v3474_v18  ;;  %v1520_v5 = vmul.f32 %v2969_v42, %v3476_v27  ;;  %v3527_v7 = vld [vmem:[#allocation2 + $0x129] sm:$0xff] }
 0x1c7   : > { %v1250_v1 = vadd.f32 %v1218_v34, %v1150_v35  ;;  %v1688_v14 = vadd.f32 %v3096_v3, %v1649_v63  ;;  %v1689_v19 = vadd.f32 %v3096_v3, %v1650_v23  ;;  %v1619_v33 = vmul.f32 %v3496_v46, %v3484_v32  ;;  %v3537_v63 = vld [vmem:[%s3908_s4] ss:$0 sm:$0xff] }
 0x1c8   : > { %v1251_v24 = vadd.f32 %v1219_v43, %v1151_v36  ;;  %v820_v25 = vmul.f32 %v3420_v60, %v2948_v6  ;;  %v821_v28 = vmul.f32 %v3424_v50, %v2948_v6  ;;  %v920_v47 = vmul.f32 %v3426_v58, %v2955_v12 }
 0x1c9   : > { %v1350_v13 = vadd.f32 %v1318_v49, %v1250_v1  ;;  %v1720_v22 = vmax.f32 %v1688_v14, 0.0  ;;  %v1721_v21 = vmax.f32 %v1689_v19, 0.0  ;;  %v921_v3 = vmul.f32 %v3428_v45, %v2955_v12  ;;  %v3549_v19 = vld [vmem:[#allocation2 + $0x12a] sm:$0xff] }
 0x1ca   : > { %v1351_v9 = vadd.f32 %v1319_v62, %v1251_v24  ;;  %v952_v39 = vadd.f32 %v920_v47, %v820_v25  ;;  %v1020_v11 = vmul.f32 %v3435_v2, %v2962_v20  ;;  %v1021_v60 = vmul.f32 %v3447_v59, %v2962_v20  ;;  %v3519_v59 = vld [vmem:[#allocation2 + $0x128] sm:$0xff] }
 0x1cb   : > { %v1451_v38 = vadd.f32 %v1419_v54, %v1350_v13  ;;  %v1752_v40 = vmin.f32 %v1720_v22, 6.0  ;;  %v1753_v50 = vmin.f32 %v1721_v21, 6.0  ;;  %v953_v29 = vadd.f32 %v921_v3, %v821_v28  ;;  %v3532_v62 = vld [vmem:[#allocation2 + $0x122] sm:$0xff] }
 0x1cc   : > { %v1452_v51 = vadd.f32 %v1420_v15, %v1351_v9  ;;  %v1052_v37 = vadd.f32 %v1020_v11, %v952_v39  ;;  %v1120_v56 = vmul.f32 %v3468_v57, %v2974_v48  ;;  %v1121_v45 = vmul.f32 %v3472_v41, %v2974_v48 }
 0x1cd   : > { %v1551_v58 = vadd.f32 %v1519_v0, %v1451_v38  ;;  %v1776_v4 = vpack.c.bf16 %v1753_v50, %v1752_v40  ;;  %v1620_v30 = vmul.f32 %v3496_v46, %v1584_v55  ;;  %v1053_v2 = vadd.f32 %v1021_v60, %v953_v29 }
 0x1ce   : > { %v1552_v17 = vadd.f32 %v1520_v5, %v1452_v51  ;;  %v1152_v8 = vadd.f32 %v1120_v56, %v1052_v37  ;;  %v1220_v26 = vmul.f32 %v3474_v18, %v2971_v44  ;;  %v1320_v10 = vmul.f32 %v3484_v32, %v2978_v52  ;;  %v3570_v56 = vld [vmem:[#allocation2 + $0x138] sm:$0xff] }
 0x1cf   : > { %v1651_v16 = vadd.f32 %v1619_v33, %v1551_v58  ;;  %2366 = vmatprep.mubr.bf16.mxu1 %v1776_v4  ;;  %v1153_v35 = vadd.f32 %v1121_v45, %v1053_v2  ;;  %v1221_v43 = vmul.f32 %v3476_v27, %v2971_v44  ;;  %v1321_v49 = vmul.f32 %v1584_v55, %v2978_v52  ;;  %v3580_v2 = vld [vmem:[#allocation2 + $0x141] sm:$0xff] }
 0x1d0   : > { %v1652_v34 = vadd.f32 %v1620_v30, %v1552_v17  ;;  %v1252_v36 = vadd.f32 %v1220_v26, %v1152_v8  ;;  %v1421_v54 = vmul.f32 %v2980_v53, %v3517_v61  ;;  %v1422_v1 = vmul.f32 %v2980_v53, %v3519_v59  ;;  %v3578_v30 = vld [vmem:[#allocation2 + $0x139] sm:$0xff] }
 0x1d1   : > { %v1690_v23 = vadd.f32 %v3537_v63, %v1651_v16  ;;  %v1253_v0 = vadd.f32 %v1221_v43, %v1153_v35  ;;  %v1521_v5 = vmul.f32 %v2969_v42, %v3525_v31  ;;  %v1522_v14 = vmul.f32 %v2969_v42, %v3527_v7 }
 0x1d2   : > { %v1691_v15 = vadd.f32 %v3537_v63, %v1652_v34  ;;  %v1352_v33 = vadd.f32 %v1320_v10, %v1252_v36  ;;  %v1621_v13 = vmul.f32 %v3496_v46, %v3532_v62  ;;  %v822_v25 = vmul.f32 %v3468_v57, %v2948_v6  ;;  %v3586_v34 = vld [vmem:[#allocation2 + $0x13a] sm:$0xff] }
 0x1d3   : > { %v1722_v24 = vmax.f32 %v1690_v23, 0.0  ;;  %v1353_v47 = vadd.f32 %v1321_v49, %v1253_v0  ;;  %v823_v22 = vmul.f32 %v3472_v41, %v2948_v6  ;;  %v922_v21 = vmul.f32 %v3474_v18, %v2955_v12 }
 0x1d4   : > { %v1723_v28 = vmax.f32 %v1691_v15, 0.0  ;;  %v1453_v9 = vadd.f32 %v1421_v54, %v1352_v33  ;;  %v1622_v3 = vmul.f32 %v3496_v46, %v3549_v19  ;;  %v923_v38 = vmul.f32 %v3476_v27, %v2955_v12 }
 0x1d5   : > { %v1022_v39 = vmul.f32 %v3484_v32, %v2962_v20  ;;  %v1754_v11 = vmin.f32 %v1722_v24, 6.0  ;;  %v1454_v60 = vadd.f32 %v1422_v1, %v1353_v47  ;;  %v954_v40 = vadd.f32 %v922_v21, %v822_v25  ;;  %v3572_v32 = vld [vmem:[#allocation2 + $0x140] sm:$0xff] }
 0x1d6   : > { %v1755_v57 = vmin.f32 %v1723_v28, 6.0  ;;  %v1553_v50 = vadd.f32 %v1521_v5, %v1453_v9  ;;  %v955_v51 = vadd.f32 %v923_v38, %v823_v22  ;;  %v1023_v41 = vmul.f32 %v1584_v55, %v2962_v20  ;;  %v1588_v21 = vld [vmem:[#allocation2 + $0x142] sm:$0xff] }
 0x1d7   : > { %v1122_v18 = vmul.f32 %v3517_v61, %v2974_v48  ;;  %v1554_v58 = vadd.f32 %v1522_v14, %v1454_v60  ;;  %v1054_v37 = vadd.f32 %v1022_v39, %v954_v40  ;;  %v1123_v27 = vmul.f32 %v3519_v59, %v2974_v48 }
 0x1d8   : > { %v1777_v29 = vpack.c.bf16 %v1755_v57, %v1754_v11  ;;  %v1653_v45 = vadd.f32 %v1621_v13, %v1553_v50  ;;  %v1055_v4 = vadd.f32 %v1023_v41, %v955_v51  ;;  %v1222_v17 = vmul.f32 %v3525_v31, %v2971_v44  ;;  %v3619_v41 = vld [vmem:[#allocation2 + $0x158] sm:$0xff] }
 0x1d9   : > { %v1223_v55 = vmul.f32 %v3527_v7, %v2971_v44  ;;  %v1654_v16 = vadd.f32 %v1622_v3, %v1554_v58  ;;  %v1154_v8 = vadd.f32 %v1122_v18, %v1054_v37  ;;  %v1322_v26 = vmul.f32 %v3532_v62, %v2978_v52  ;;  %v3625_v37 = vld [vmem:[#allocation2 + $0x151] sm:$0xff] }
 0x1da   : > { %2367 = vmatmul.mubr.bf16.gmra.mxu1 %v1777_v29  ;;  %v1323_v10 = vmul.f32 %v3549_v19, %v2978_v52  ;;  %v1692_v35 = vadd.f32 %v3537_v63, %v1653_v45  ;;  %v1155_v43 = vadd.f32 %v1123_v27, %v1055_v4  ;;  %v1423_v49 = vmul.f32 %v2980_v53, %v3570_v56  ;;  %v3627_v27 = vld [vmem:[#allocation2 + $0x159] sm:$0xff] }
 0x1db   : > { %v1424_v23 = vmul.f32 %v2980_v53, %v3572_v32  ;;  %v1693_v36 = vadd.f32 %v3537_v63, %v1654_v16  ;;  %v1254_v54 = vadd.f32 %v1222_v17, %v1154_v8  ;;  %v1523_v1 = vmul.f32 %v2969_v42, %v3578_v30  ;;  %v3632_v16 = vld [vmem:[#allocation2 + $0x152] sm:$0xff] }
 0x1dc   : > { %v1524_v15 = vmul.f32 %v2969_v42, %v3580_v2  ;;  %v1724_v0 = vmax.f32 %v1692_v35, 0.0  ;;  %v1255_v5 = vadd.f32 %v1223_v55, %v1155_v43  ;;  %v1623_v14 = vmul.f32 %v3496_v46, %v3586_v34 }
 0x1dd   : > { %v824_v24 = vmul.f32 %v3517_v61, %v2948_v6  ;;  %v1725_v33 = vmax.f32 %v1693_v36, 0.0  ;;  %v1354_v13 = vadd.f32 %v1322_v26, %v1254_v54  ;;  %v825_v25 = vmul.f32 %v3519_v59, %v2948_v6 }
 0x1de   : > { %v924_v28 = vmul.f32 %v3525_v31, %v2955_v12  ;;  %v1756_v47 = vmin.f32 %v1724_v0, 6.0  ;;  %v1355_v22 = vadd.f32 %v1323_v10, %v1255_v5  ;;  %v925_v9 = vmul.f32 %v3527_v7, %v2955_v12 }
 0x1df   : > { %v1024_v3 = vmul.f32 %v3532_v62, %v2962_v20  ;;  %v1757_v38 = vmin.f32 %v1725_v33, 6.0  ;;  %v1455_v39 = vadd.f32 %v1423_v49, %v1354_v13  ;;  %v1025_v11 = vmul.f32 %v3549_v19, %v2962_v20  ;;  %v3617_v62 = vld [vmem:[#allocation2 + $0x150] sm:$0xff] }
 0x1e0   : > { %v956_v61 = vadd.f32 %v924_v28, %v824_v24  ;;  %v1456_v57 = vadd.f32 %v1424_v23, %v1355_v22  ;;  %v957_v59 = vadd.f32 %v925_v9, %v825_v25  ;;  %v1124_v31 = vmul.f32 %v3570_v56, %v2974_v48 }
 0x1e1   : > { %v1125_v60 = vmul.f32 %v3572_v32, %v2974_v48  ;;  %v1778_v40 = vpack.c.bf16 %v1757_v38, %v1756_v47  ;;  %v1555_v50 = vadd.f32 %v1523_v1, %v1455_v39  ;;  %v1624_v7 = vmul.f32 %v3496_v46, %v1588_v21 }
 0x1e2   : > { %v1056_v51 = vadd.f32 %v1024_v3, %v956_v61  ;;  %v1556_v18 = vadd.f32 %v1524_v15, %v1456_v57  ;;  %v1057_v29 = vadd.f32 %v1025_v11, %v957_v59  ;;  %v1224_v19 = vmul.f32 %v3578_v30, %v2971_v44  ;;  %v1590_v15 = vld [vmem:[#allocation2 + $0x15a] sm:$0xff] }
 0x1e3   : > { %v1225_v58 = vmul.f32 %v3580_v2, %v2971_v44  ;;  %2370 = vmatprep.mubr.bf16.mxu1 %v1778_v40  ;;  %v1655_v45 = vadd.f32 %v1623_v14, %v1555_v50  ;;  %v1324_v17 = vmul.f32 %v3586_v34, %v2978_v52  ;;  %v1325_v55 = vmul.f32 %v1588_v21, %v2978_v52 }
 0x1e4   : > { %v1156_v4 = vadd.f32 %v1124_v31, %v1056_v51  ;;  %v1656_v8 = vadd.f32 %v1624_v7, %v1556_v18  ;;  %v1157_v26 = vadd.f32 %v1125_v60, %v1057_v29  ;;  %v1425_v10 = vmul.f32 %v2980_v53, %v3617_v62  ;;  %v3662_v31 = vld [vmem:[#allocation2 + $0x168] sm:$0xff]  ;;  %v3666_v7 = vld [vmem:[#allocation2 + $0x170] sm:$0xff] }
 0x1e5   : > { %v1426_v35 = vmul.f32 %v2980_v53, %v3619_v41  ;;  %v1694_v43 = vadd.f32 %v3537_v63, %v1655_v45  ;;  %v1525_v23 = vmul.f32 %v2969_v42, %v3625_v37  ;;  %v1526_v36 = vmul.f32 %v2969_v42, %v3627_v27  ;;  %v3668_v51 = vld [vmem:[#allocation2 + $0x169] sm:$0xff] }
 0x1e6   : > { %v1256_v49 = vadd.f32 %v1224_v19, %v1156_v4  ;;  %v1695_v54 = vadd.f32 %v3537_v63, %v1656_v8  ;;  %v1257_v1 = vadd.f32 %v1225_v58, %v1157_v26  ;;  %v1625_v0 = vmul.f32 %v3496_v46, %v3632_v16  ;;  %v3674_v58 = vld [vmem:[#allocation2 + $0x171] sm:$0xff] }
 0x1e7   : > { %v826_v5 = vmul.f32 %v3570_v56, %v2948_v6  ;;  %v1726_v14 = vmax.f32 %v1694_v43, 0.0  ;;  %v827_v33 = vmul.f32 %v3572_v32, %v2948_v6  ;;  %v926_v13 = vmul.f32 %v3578_v30, %v2955_v12  ;;  %v3676_v45 = vld [vmem:[#allocation2 + $0x16a] sm:$0xff] }
 0x1e8   : > { %v1356_v24 = vadd.f32 %v1324_v17, %v1256_v49  ;;  %v1727_v25 = vmax.f32 %v1695_v54, 0.0  ;;  %v1357_v28 = vadd.f32 %v1325_v55, %v1257_v1  ;;  %v927_v47 = vmul.f32 %v3580_v2, %v2955_v12 }
 0x1e9   : > { %v1026_v22 = vmul.f32 %v3586_v34, %v2962_v20  ;;  %v1758_v9 = vmin.f32 %v1726_v14, 6.0  ;;  %v1626_v56 = vmul.f32 %v3496_v46, %v1590_v15  ;;  %v958_v38 = vadd.f32 %v926_v13, %v826_v5  ;;  %v1592_v13 = vld [vmem:[#allocation2 + $0x172] sm:$0xff] }
 0x1ea   : > { %v1457_v3 = vadd.f32 %v1425_v10, %v1356_v24  ;;  %v1759_v39 = vmin.f32 %v1727_v25, 6.0  ;;  %v1458_v61 = vadd.f32 %v1426_v35, %v1357_v28  ;;  %v959_v11 = vadd.f32 %v927_v47, %v827_v33 }
 0x1eb   : > { %v1027_v32 = vmul.f32 %v1588_v21, %v2962_v20  ;;  %v1058_v30 = vadd.f32 %v1026_v22, %v958_v38  ;;  %v1126_v59 = vmul.f32 %v3617_v62, %v2974_v48  ;;  %v1127_v2 = vmul.f32 %v3619_v41, %v2974_v48 }
 0x1ec   : > { %v1557_v57 = vadd.f32 %v1525_v23, %v1457_v3  ;;  %v1779_v34 = vpack.c.bf16 %v1759_v39, %v1758_v9  ;;  %v1558_v60 = vadd.f32 %v1526_v36, %v1458_v61  ;;  %v1226_v50 = vmul.f32 %v3625_v37, %v2971_v44 }
 0x1ed   : > { %v1059_v40 = vadd.f32 %v1027_v32, %v959_v11  ;;  %v1158_v18 = vadd.f32 %v1126_v59, %v1058_v30  ;;  %v1227_v29 = vmul.f32 %v3627_v27, %v2971_v44  ;;  %v1326_v19 = vmul.f32 %v3632_v16, %v2978_v52  ;;  %v1394_v59 = vld [vmem:[#allocation2 + $0x188] sm:$0xff] }
 0x1ee   : > { %v1657_v21 = vadd.f32 %v1625_v0, %v1557_v57  ;;  %2371 = vmatmul.mubr.bf16.gmra.mxu1 %v1779_v34  ;;  %v1658_v4 = vadd.f32 %v1626_v56, %v1558_v60  ;;  %v1327_v55 = vmul.f32 %v1590_v15, %v2978_v52  ;;  %v1427_v8 = vmul.f32 %v2980_v53, %v3662_v31  ;;  %v1493_v60 = vld [vmem:[#allocation2 + $0x181] sm:$0xff] }
 0x1ef   : > { %v1159_v17 = vadd.f32 %v1127_v2, %v1059_v40  ;;  %v1258_v10 = vadd.f32 %v1226_v50, %v1158_v18  ;;  %v1428_v35 = vmul.f32 %v2980_v53, %v3666_v7  ;;  %v1527_v43 = vmul.f32 %v2969_v42, %v3668_v51 }
 0x1f0   : > { %v1696_v26 = vadd.f32 %v3537_v63, %v1657_v21  ;;  %v1697_v49 = vadd.f32 %v3537_v63, %v1658_v4  ;;  %v1528_v36 = vmul.f32 %v2969_v42, %v3674_v58  ;;  %v1627_v54 = vmul.f32 %v3496_v46, %v3676_v45 }
 0x1f1   : > { %v1259_v23 = vadd.f32 %v1227_v29, %v1159_v17  ;;  %v1358_v0 = vadd.f32 %v1326_v19, %v1258_v10  ;;  %v828_v5 = vmul.f32 %v3617_v62, %v2948_v6  ;;  %v829_v14 = vmul.f32 %v3619_v41, %v2948_v6  ;;  %v1494_v29 = vld [vmem:[#allocation2 + $0x189] sm:$0xff] }
 0x1f2   : > { %v1728_v1 = vmax.f32 %v1696_v26, 0.0  ;;  %v1729_v24 = vmax.f32 %v1697_v49, 0.0  ;;  %v928_v25 = vmul.f32 %v3625_v37, %v2955_v12  ;;  %v929_v28 = vmul.f32 %v3627_v27, %v2955_v12 }
 0x1f3   : > { %v1359_v33 = vadd.f32 %v1327_v55, %v1259_v23  ;;  %v1459_v22 = vadd.f32 %v1427_v8, %v1358_v0  ;;  %v1028_v9 = vmul.f32 %v3632_v16, %v2962_v20  ;;  %v1029_v3 = vmul.f32 %v1590_v15, %v2962_v20  ;;  %v1393_v16 = vld [vmem:[#allocation2 + $0x180] sm:$0xff] }
 0x1f4   : > { %v1760_v47 = vmin.f32 %v1728_v1, 6.0  ;;  %v1761_v62 = vmin.f32 %v1729_v24, 6.0  ;;  %v960_v38 = vadd.f32 %v928_v25, %v828_v5  ;;  %v961_v41 = vadd.f32 %v929_v28, %v829_v14  ;;  %v1594_v14 = vld [vmem:[#allocation2 + $0x18a] sm:$0xff] }
 0x1f5   : > { %v1460_v56 = vadd.f32 %v1428_v35, %v1359_v33  ;;  %v1559_v39 = vadd.f32 %v1527_v43, %v1459_v22  ;;  %v1628_v61 = vmul.f32 %v3496_v46, %v1592_v13  ;;  %v1128_v37 = vmul.f32 %v3662_v31, %v2974_v48  ;;  %v1593_v43 = vld [vmem:[#allocation2 + $0x182] sm:$0xff] }
 0x1f6   : > { %v1129_v27 = vmul.f32 %v3666_v7, %v2974_v48  ;;  %v1780_v11 = vpack.c.bf16 %v1761_v62, %v1760_v47  ;;  %v1060_v57 = vadd.f32 %v1028_v9, %v960_v38  ;;  %v1061_v30 = vadd.f32 %v1029_v3, %v961_v41 }
 0x1f7   : > { %v1560_v32 = vadd.f32 %v1528_v36, %v1460_v56  ;;  %v1659_v15 = vadd.f32 %v1627_v54, %v1559_v39  ;;  %v1228_v2 = vmul.f32 %v3668_v51, %v2971_v44  ;;  %v1229_v34 = vmul.f32 %v3674_v58, %v2971_v44 }
 0x1f8   : > { %2374 = vmatprep.mubr.bf16.mxu1 %v1780_v11  ;;  %v1160_v50 = vadd.f32 %v1128_v37, %v1060_v57  ;;  %v1161_v21 = vadd.f32 %v1129_v27, %v1061_v30  ;;  %v1328_v18 = vmul.f32 %v3676_v45, %v2978_v52  ;;  %v1329_v4 = vmul.f32 %v1592_v13, %v2978_v52 }
 0x1f9   : > { %v1660_v40 = vadd.f32 %v1628_v61, %v1560_v32  ;;  %v1698_v19 = vadd.f32 %v3537_v63, %v1659_v15  ;;  %v1429_v17 = vmul.f32 %v2980_v53, %v1393_v16  ;;  %v1430_v55 = vmul.f32 %v2980_v53, %v1394_v59 }
 0x1fa   : > { %v1260_v26 = vadd.f32 %v1228_v2, %v1160_v50  ;;  %v1261_v10 = vadd.f32 %v1229_v34, %v1161_v21  ;;  %v1529_v35 = vmul.f32 %v2969_v42, %v1493_v60  ;;  %v1530_v23 = vmul.f32 %v2969_v42, %v1494_v29  ;;  %v1595_v50 = vld [vmem:[#allocation2 + $0x19a] sm:$0xff] }
 0x1fb   : > { %v1699_v8 = vadd.f32 %v3537_v63, %v1660_v40  ;;  %v1730_v49 = vmax.f32 %v1698_v19, 0.0  ;;  %v830_v36 = vmul.f32 %v3662_v31, %v2948_v6  ;;  %v831_v54 = vmul.f32 %v3666_v7, %v2948_v6  ;;  %v2484_v40 = vld [vmem:[#allocation2 + $0x8] sm:$0xff] }
 0x1fc   : > { %v1360_v0 = vadd.f32 %v1328_v18, %v1260_v26  ;;  %v1361_v5 = vadd.f32 %v1329_v4, %v1261_v10  ;;  %v930_v24 = vmul.f32 %v3668_v51, %v2955_v12  ;;  %v1629_v25 = vmul.f32 %v3496_v46, %v1593_v43  ;;  %v1596_v19 = vld [vmem:[#allocation2 + $0x1a2] sm:$0xff] }
 0x1fd   : > { %v1731_v1 = vmax.f32 %v1699_v8, 0.0  ;;  %v1762_v33 = vmin.f32 %v1730_v49, 6.0  ;;  %v931_v28 = vmul.f32 %v3674_v58, %v2955_v12  ;;  %v1030_v47 = vmul.f32 %v3676_v45, %v2962_v20  ;;  %v1395_v58 = vld [vmem:[#allocation2 + $0x198] sm:$0xff] }
 0x1fe   : > { %v1461_v22 = vadd.f32 %v1429_v17, %v1360_v0  ;;  %v1462_v9 = vadd.f32 %v1430_v55, %v1361_v5  ;;  %v962_v6 = vadd.f32 %v930_v24, %v830_v36  ;;  %v1630_v7 = vmul.f32 %v3496_v46, %v1594_v14 }
 0x1ff   : > { %v1763_v31 = vmin.f32 %v1731_v1, 6.0  ;;  %v963_v3 = vadd.f32 %v931_v28, %v831_v54  ;;  %v1031_v62 = vmul.f32 %v1592_v13, %v2962_v20  ;;  %v1130_v51 = vmul.f32 %v1393_v16, %v2974_v48  ;;  %v1495_v13 = vld [vmem:[#allocation2 + $0x199] sm:$0xff] }
 0x200   : > { %v1561_v38 = vadd.f32 %v1529_v35, %v1461_v22  ;;  %v1562_v41 = vadd.f32 %v1530_v23, %v1462_v9  ;;  %v1062_v39 = vadd.f32 %v1030_v47, %v962_v6  ;;  %v1131_v12 = vmul.f32 %v1394_v59, %v2974_v48  ;;  %v1496_v59 = vld [vmem:[#allocation2 + $0x1a1] sm:$0xff]  ;;  %v2486_v9 = vld [vmem:[%s2902_s19] sm:$0xff] }
 0x201   : > { %v1781_v56 = vpack.c.bf16 %v1763_v31, %v1762_v33  ;;  %v1063_v61 = vadd.f32 %v1031_v62, %v963_v3  ;;  %v1230_v11 = vmul.f32 %v1493_v60, %v2971_v44  ;;  %v1231_v57 = vmul.f32 %v1494_v29, %v2971_v44  ;;  %v2485_v47 = vld [vmem:[%s2902_s19 + $0x10] sm:$0xff]  ;;  %v2487_v62 = vld [vmem:[%s2902_s19 + $0x18] sm:$0xff] }
 0x202   : > { %v1661_v45 = vadd.f32 %v1629_v25, %v1561_v38  ;;  %v1662_v37 = vadd.f32 %v1630_v7, %v1562_v41  ;;  %v1162_v27 = vadd.f32 %v1130_v51, %v1062_v39  ;;  %v1330_v20 = vmul.f32 %v1593_v43, %v2978_v52  ;;  %v2488_v38 = vld [vmem:[%s2902_s19 + $0x8] sm:$0xff] }
 0x203   : > { %2375 = vmatmul.mubr.bf16.gmra.mxu1 %v1781_v56  ;;  %v1163_v32 = vadd.f32 %v1131_v12, %v1063_v61  ;;  %v1431_v48 = vmul.f32 %v2980_v53, %v1395_v58  ;;  %v1331_v34 = vmul.f32 %v1594_v14, %v2978_v52  ;;  %v1432_v60 = vmul.f32 %v2484_v40, %v2980_v53  ;;  %v2489_v58 = vld [vmem:[%s2902_s19 + $0x30] sm:$0xff] }
 0x204   : > { %v1700_v30 = vadd.f32 %v3537_v63, %v1661_v45  ;;  %v1701_v16 = vadd.f32 %v3537_v63, %v1662_v37  ;;  %v1262_v15 = vadd.f32 %v1230_v11, %v1162_v27  ;;  %v1531_v29 = vmul.f32 %v2969_v42, %v1495_v13  ;;  %v2490_v11 = vld [vmem:[%s2902_s19 + $0x20] sm:$0xff]  ;;  %v2491_v13 = vld [vmem:[%s2902_s19 + $0x38] sm:$0xff]  ;;  %v2493_v40 = vld [vmem:[%s2902_s19 + $0x50] sm:$0xff] }
 0x205   : > { %v1263_v2 = vadd.f32 %v1231_v57, %v1163_v32  ;;  %v1532_v17 = vmul.f32 %v2969_v42, %v1496_v59  ;;  %v1631_v10 = vmul.f32 %v3496_v46, %v1595_v50  ;;  %v1632_v52 = vmul.f32 %v3496_v46, %v1596_v19  ;;  %v3752_v46 = vld [vmem:[%s3910_s6] ss:$0 sm:$0xff] }
 0x206   : > { %v1732_v21 = vmax.f32 %v1700_v30, 0.0  ;;  %v1733_v44 = vmax.f32 %v1701_v16, 0.0  ;;  %v1362_v18 = vadd.f32 %v1330_v20, %v1262_v15  ;;  %v2492_v15 = vld [vmem:[%s2902_s19 + $0x28] sm:$0xff] }
 0x207   : > { %v1363_v4 = vadd.f32 %v1331_v34, %v1263_v2 }
 0x208   : > { %v1764_v55 = vmin.f32 %v1732_v21, 6.0  ;;  %v1765_v8 = vmin.f32 %v1733_v44, 6.0  ;;  %v1463_v26 = vadd.f32 %v1431_v48, %v1362_v18  ;;  %v2494_v44 = vld [vmem:[%s2902_s19 + $0x40] sm:$0xff] }
 0x209   : > { %v1464_v35 = vadd.f32 %v1432_v60, %v1363_v4  ;;  %v2495_v4 = vld [vmem:[%s2902_s19 + $0x58] sm:$0xff] }
 0x20a   : > { %v1782_v43 = vpack.c.bf16 %v1765_v8, %v1764_v55  ;;  %v1563_v53 = vadd.f32 %v1531_v29, %v1463_v26  ;;  %v2496_v8 = vld [vmem:[%s2902_s19 + $0x48] sm:$0xff] }
 0x20b   : > { %v1564_v49 = vadd.f32 %v1532_v17, %v1464_v35 }
 0x20c   : > { %2378 = vmatprep.mubr.bf16.mxu1 %v1782_v43  ;;  %v1663_v23 = vadd.f32 %v1631_v10, %v1563_v53  ;;  %v2497_v43 = vld [vmem:[%s2902_s19 + $0x70] sm:$0xff] }
 0x20d   : > { %v1664_v36 = vadd.f32 %v1632_v52, %v1564_v49 }
 0x20e   : > { %v1702_v54 = vadd.f32 %v3537_v63, %v1663_v23 }
 0x20f   : > { %v1703_v42 = vadd.f32 %v3537_v63, %v1664_v36  ;;  %v2498_v36 = vld [vmem:[%s2902_s19 + $0x60] sm:$0xff] }
 0x210   : > { %v1734_v1 = vmax.f32 %v1702_v54, 0.0 }
 0x211   : > { %v1735_v0 = vmax.f32 %v1703_v42, 0.0 }
 0x212   : > { %v1766_v5 = vmin.f32 %v1734_v1, 6.0 }
 0x213   : > { %v1767_v14 = vmin.f32 %v1735_v0, 6.0  ;;  %v2499_v0 = vld [vmem:[%s2902_s19 + $0x78] sm:$0xff] }
 0x215   : > { %v1783_v24 = vpack.c.bf16 %v1767_v14, %v1766_v5 }
 0x217   : > { %2379 = vmatmul.mubr.bf16.gmra.mxu1 %v1783_v24  ;;  %v2500_v24 = vld [vmem:[%s2902_s19 + $0x68] sm:$0xff] }
 0x23b   : > { %v2352_v33 = vpop.f32.mrf.mxu1 }
 0x23c   : > { %v1898_v25 = vadd.f32 %v2352_v33, %v3752_v46 }
 0x23d   : > { %v1889_v28 = vpop.f32.mrf.mxu1 }
 0x23e   : > { %v2018_v63 = vadd.f32 %v2485_v47, %v1898_v25  ;;  %v1890_v31 = vadd.f32 %v3752_v46, %v1889_v28 }
 0x23f   : > { %v2353_v22 = vpop.f32.mrf.mxu1 }
 0x240   : > { %2050 = vst [vmem:[%s3759_s10 + $0x10] sm:$0xff] %v2018_v63  ;;  %v2016_v6 = vadd.f32 %v2486_v9, %v1890_v31  ;;  %v1901_v7 = vadd.f32 %v2353_v22, %v3752_v46  ;;  %v2501_v63 = vld [vmem:[%s2902_s19 + $0x90] sm:$0xff] }
 0x241   : > { %v1892_v3 = vpop.f32.mrf.mxu1 }
 0x242   : > { %2048 = vst [vmem:[%s3759_s10] sm:$0xff] %v2016_v6  ;;  %v2019_v51 = vadd.f32 %v2487_v62, %v1901_v7  ;;  %v1893_v56 = vadd.f32 %v3752_v46, %v1892_v3  ;;  %v2502_v6 = vld [vmem:[%s2902_s19 + $0x80] sm:$0xff] }
 0x244   : > { %2051 = vst [vmem:[%s3759_s10 + $0x18] sm:$0xff] %v2019_v51  ;;  %v2017_v41 = vadd.f32 %v2488_v38, %v1893_v56  ;;  %v2503_v51 = vld [vmem:[%s2902_s19 + $0x98] sm:$0xff] }
 0x246   : > { %2049 = vst [vmem:[%s3759_s10 + $0x8] sm:$0xff] %v2017_v41  ;;  %v2504_v41 = vld [vmem:[%s2902_s19 + $0x88] sm:$0xff] }
 0x259   : > { %v2356_v39 = vpop.f32.mrf.mxu1 }
 0x25a   : > { %v1914_v61 = vadd.f32 %v2356_v39, %v3752_v46 }
 0x25b   : > { %v1905_v12 = vpop.f32.mrf.mxu1 }
 0x25c   : > { %v2022_v45 = vadd.f32 %v2489_v58, %v1914_v61  ;;  %v1906_v37 = vadd.f32 %v3752_v46, %v1905_v12 }
 0x25d   : > { %v2357_v27 = vpop.f32.mrf.mxu1 }
 0x25e   : > { %2054 = vst [vmem:[%s3759_s10 + $0x30] sm:$0xff] %v2022_v45  ;;  %v2020_v32 = vadd.f32 %v2490_v11, %v1906_v37  ;;  %v1917_v57 = vadd.f32 %v2357_v27, %v3752_v46  ;;  %v2505_v45 = vld [vmem:[%s2902_s19 + $0xb0] sm:$0xff] }
 0x25f   : > { %v1908_v20 = vpop.f32.mrf.mxu1 }
 0x260   : > { %2052 = vst [vmem:[%s3759_s10 + $0x20] sm:$0xff] %v2020_v32  ;;  %v2023_v30 = vadd.f32 %v2491_v13, %v1917_v57  ;;  %v1909_v16 = vadd.f32 %v3752_v46, %v1908_v20  ;;  %v2506_v32 = vld [vmem:[%s2902_s19 + $0xa0] sm:$0xff] }
 0x262   : > { %2055 = vst [vmem:[%s3759_s10 + $0x38] sm:$0xff] %v2023_v30  ;;  %v2021_v48 = vadd.f32 %v2492_v15, %v1909_v16  ;;  %v2507_v30 = vld [vmem:[%s2902_s19 + $0xb8] sm:$0xff] }
 0x264   : > { %2053 = vst [vmem:[%s3759_s10 + $0x28] sm:$0xff] %v2021_v48  ;;  %v2508_v48 = vld [vmem:[%s2902_s19 + $0xa8] sm:$0xff] }
 0x271   : > { %v2360_v59 = vpop.f32.mrf.mxu1 }
 0x272   : > { %v1930_v2 = vadd.f32 %v2360_v59, %v3752_v46 }
 0x273   : > { %v1921_v34 = vpop.f32.mrf.mxu1 }
 0x274   : > { %v2026_v60 = vadd.f32 %v2493_v40, %v1930_v2  ;;  %v1922_v50 = vadd.f32 %v3752_v46, %v1921_v34 }
 0x275   : > { %v2361_v21 = vpop.f32.mrf.mxu1 }
 0x276   : > { %2058 = vst [vmem:[%s3759_s10 + $0x50] sm:$0xff] %v2026_v60  ;;  %v2024_v18 = vadd.f32 %v2494_v44, %v1922_v50  ;;  %v1933_v29 = vadd.f32 %v2361_v21, %v3752_v46  ;;  %v2509_v60 = vld [vmem:[%s2902_s19 + $0xd0] sm:$0xff] }
 0x277   : > { %v1924_v19 = vpop.f32.mrf.mxu1 }
 0x278   : > { %2056 = vst [vmem:[%s3759_s10 + $0x40] sm:$0xff] %v2024_v18  ;;  %v2027_v17 = vadd.f32 %v2495_v4, %v1933_v29  ;;  %v1925_v55 = vadd.f32 %v3752_v46, %v1924_v19  ;;  %v2510_v18 = vld [vmem:[%s2902_s19 + $0xc0] sm:$0xff] }
 0x27a   : > { %2059 = vst [vmem:[%s3759_s10 + $0x58] sm:$0xff] %v2027_v17  ;;  %v2025_v26 = vadd.f32 %v2496_v8, %v1925_v55  ;;  %v2511_v17 = vld [vmem:[%s2902_s19 + $0xd8] sm:$0xff] }
 0x27c   : > { %2057 = vst [vmem:[%s3759_s10 + $0x48] sm:$0xff] %v2025_v26  ;;  %v2512_v26 = vld [vmem:[%s2902_s19 + $0xc8] sm:$0xff] }
 0x284   : > { %v2364_v10 = vpop.f32.mrf.mxu1 }
 0x285   : > { %v1946_v35 = vadd.f32 %v2364_v10, %v3752_v46 }
 0x286   : > { %v1937_v52 = vpop.f32.mrf.mxu1 }
 0x287   : > { %v2030_v53 = vadd.f32 %v2497_v43, %v1946_v35  ;;  %v1938_v49 = vadd.f32 %v3752_v46, %v1937_v52 }
 0x288   : > { %v2365_v23 = vpop.f32.mrf.mxu1 }
 0x289   : > { %2062 = vst [vmem:[%s3759_s10 + $0x70] sm:$0xff] %v2030_v53  ;;  %v2028_v54 = vadd.f32 %v2498_v36, %v1938_v49  ;;  %v1949_v42 = vadd.f32 %v2365_v23, %v3752_v46  ;;  %v2513_v53 = vld [vmem:[%s2902_s19 + $0xf0] sm:$0xff] }
 0x28a   : > { %v1940_v1 = vpop.f32.mrf.mxu1 }
 0x28b   : > { %2060 = vst [vmem:[%s3759_s10 + $0x60] sm:$0xff] %v2028_v54  ;;  %v2031_v5 = vadd.f32 %v2499_v0, %v1949_v42  ;;  %v1941_v14 = vadd.f32 %v3752_v46, %v1940_v1  ;;  %v2514_v54 = vld [vmem:[%s2902_s19 + $0xe0] sm:$0xff] }
 0x28d   : > { %2063 = vst [vmem:[%s3759_s10 + $0x78] sm:$0xff] %v2031_v5  ;;  %v2029_v33 = vadd.f32 %v2500_v24, %v1941_v14  ;;  %v2515_v5 = vld [vmem:[%s2902_s19 + $0xf8] sm:$0xff] }
 0x28f   : > { %2061 = vst [vmem:[%s3759_s10 + $0x68] sm:$0xff] %v2029_v33  ;;  %v2516_v33 = vld [vmem:[%s2902_s19 + $0xe8] sm:$0xff] }
 0x29a   : > { %v2368_v25 = vpop.f32.mrf.mxu1 }
 0x29b   : > { %v1962_v28 = vadd.f32 %v2368_v25, %v3752_v46 }
 0x29c   : > { %v1953_v47 = vpop.f32.mrf.mxu1 }
 0x29d   : > { %v2034_v31 = vadd.f32 %v2501_v63, %v1962_v28  ;;  %v1954_v22 = vadd.f32 %v3752_v46, %v1953_v47 }
 0x29e   : > { %v2369_v9 = vpop.f32.mrf.mxu1 }
 0x29f   : > { %2066 = vst [vmem:[%s3759_s10 + $0x90] sm:$0xff] %v2034_v31  ;;  %v2032_v7 = vadd.f32 %v2502_v6, %v1954_v22  ;;  %v1965_v3 = vadd.f32 %v2369_v9, %v3752_v46 }
 0x2a0   : > { %v1956_v62 = vpop.f32.mrf.mxu1 }
 0x2a1   : > { %2064 = vst [vmem:[%s3759_s10 + $0x80] sm:$0xff] %v2032_v7  ;;  %v2035_v56 = vadd.f32 %v2503_v51, %v1965_v3  ;;  %v1957_v38 = vadd.f32 %v3752_v46, %v1956_v62 }
 0x2a3   : > { %2067 = vst [vmem:[%s3759_s10 + $0x98] sm:$0xff] %v2035_v56  ;;  %v2033_v39 = vadd.f32 %v2504_v41, %v1957_v38 }
 0x2a5   : > { %2065 = vst [vmem:[%s3759_s10 + $0x88] sm:$0xff] %v2033_v39 }
 0x2ae   : > { %v2372_v61 = vpop.f32.mrf.mxu1 }
 0x2af   : > { %v1978_v12 = vadd.f32 %v2372_v61, %v3752_v46 }
 0x2b0   : > { %v1969_v58 = vpop.f32.mrf.mxu1 }
 0x2b1   : > { %v2038_v37 = vadd.f32 %v2505_v45, %v1978_v12  ;;  %v1970_v27 = vadd.f32 %v3752_v46, %v1969_v58 }
 0x2b2   : > { %v2373_v11 = vpop.f32.mrf.mxu1 }
 0x2b3   : > { %2070 = vst [vmem:[%s3759_s10 + $0xb0] sm:$0xff] %v2038_v37  ;;  %v2036_v57 = vadd.f32 %v2506_v32, %v1970_v27  ;;  %v1981_v20 = vadd.f32 %v2373_v11, %v3752_v46 }
 0x2b4   : > { %v1972_v13 = vpop.f32.mrf.mxu1 }
 0x2b5   : > { %2068 = vst [vmem:[%s3759_s10 + $0xa0] sm:$0xff] %v2036_v57  ;;  %v2039_v16 = vadd.f32 %v2507_v30, %v1981_v20  ;;  %v1973_v15 = vadd.f32 %v3752_v46, %v1972_v13 }
 0x2b7   : > { %2071 = vst [vmem:[%s3759_s10 + $0xb8] sm:$0xff] %v2039_v16  ;;  %v2037_v59 = vadd.f32 %v2508_v48, %v1973_v15 }
 0x2b9   : > { %2069 = vst [vmem:[%s3759_s10 + $0xa8] sm:$0xff] %v2037_v59 }
 0x2c3   : > { %v2376_v2 = vpop.f32.mrf.mxu1 }
 0x2c4   : > { %v1994_v34 = vadd.f32 %v2376_v2, %v3752_v46 }
 0x2c5   : > { %v1985_v40 = vpop.f32.mrf.mxu1 }
 0x2c6   : > { %v2042_v50 = vadd.f32 %v2509_v60, %v1994_v34  ;;  %v1986_v21 = vadd.f32 %v3752_v46, %v1985_v40 }
 0x2c7   : > { %v2377_v44 = vpop.f32.mrf.mxu1 }
 0x2c8   : > { %2074 = vst [vmem:[%s3759_s10 + $0xd0] sm:$0xff] %v2042_v50  ;;  %v2040_v29 = vadd.f32 %v2510_v18, %v1986_v21  ;;  %v1997_v19 = vadd.f32 %v2377_v44, %v3752_v46 }
 0x2c9   : > { %v1988_v4 = vpop.f32.mrf.mxu1 }
 0x2ca   : > { %2072 = vst [vmem:[%s3759_s10 + $0xc0] sm:$0xff] %v2040_v29  ;;  %v2043_v55 = vadd.f32 %v2511_v17, %v1997_v19  ;;  %v1989_v8 = vadd.f32 %v3752_v46, %v1988_v4 }
 0x2cc   : > { %2075 = vst [vmem:[%s3759_s10 + $0xd8] sm:$0xff] %v2043_v55  ;;  %v2041_v10 = vadd.f32 %v2512_v26, %v1989_v8 }
 0x2ce   : > { %2073 = vst [vmem:[%s3759_s10 + $0xc8] sm:$0xff] %v2041_v10 }
 0x2d7   : > { %v2380_v35 = vpop.f32.mrf.mxu1 }
 0x2d8   : > { %v2010_v52 = vadd.f32 %v2380_v35, %v3752_v46 }
 0x2d9   : > { %v2001_v43 = vpop.f32.mrf.mxu1 }
 0x2da   : > { %v2046_v49 = vadd.f32 %v2513_v53, %v2010_v52  ;;  %v2002_v23 = vadd.f32 %v3752_v46, %v2001_v43 }
 0x2db   : > { %v2381_v36 = vpop.f32.mrf.mxu1 }
 0x2dc   : > { %2078 = vst [vmem:[%s3759_s10 + $0xf0] sm:$0xff] %v2046_v49  ;;  %v2044_v42 = vadd.f32 %v2514_v54, %v2002_v23  ;;  %v2013_v1 = vadd.f32 %v2381_v36, %v3752_v46 }
 0x2dd   : > { %v2004_v0 = vpop.f32.mrf.mxu1 }
 0x2de   : > { %2076 = vst [vmem:[%s3759_s10 + $0xe0] sm:$0xff] %v2044_v42  ;;  %v2047_v14 = vadd.f32 %v2515_v5, %v2013_v1  ;;  %v2005_v24 = vadd.f32 %v3752_v46, %v2004_v0 }
 0x2e0   : > { %2079 = vst [vmem:[%s3759_s10 + $0xf8] sm:$0xff] %v2047_v14  ;;  %v2045_v25 = vadd.f32 %v2516_v33, %v2005_v24 }
 0x2e2   : > { %2077 = vst [vmem:[%s3759_s10 + $0xe8] sm:$0xff] %v2045_v25 }
 0x2e3   : > { %2636 = shalt.err (!%p2633_p9)
}
 0x2e4   : > { %s2637_s19 = scalar_lea.hbm %s3856_s30, 4096  ;;  %s2641_s29 = scalar_lea.hbm %s3911_s7, 8192 }
 0x2e5   : > { %p2638_p1 = scmp.ne.s32.totalorder %s3856_s30, %s2637_s19  ;;  %p2642_p8 = scmp.lt.s32.totalorder %s3856_s30, %s3911_s7 }
 0x2e6   : > { %p2643_p3 = scmp.lt.s32.totalorder %s2641_s29, %s2637_s19 }
 0x2e7   : > { %p2639_p4 = pnand %p2638_p1, %p3934_p12 }
 0x2e8   : > { %p2644_p11 = por %p2643_p3, %p2642_p8 }
 0x2e9   : > { %p2640_p6 = pneg %p2639_p4 }
 0x2eb   : > { %p2645_p7 = pnand %p2644_p11, %p2640_p6 }
 0x2ed   : > { %2648 = shalt.err (!%p2645_p7)
}
 0x2ee   : > { %s2707_s1 = smov 128   ;;  %s2708_s15 = smov 8  }
 0x2ef   : > { %2396 = dma.vmem_to_hbm [thread:$0]  (%p3934_p12), %s3858_s14, 4096, %s3856_s30, %s2081_s28, %s2707_s1, %s2707_s1, %s2708_s15  }
 0x2f0 PF: > { %s2109_s9 = sand.u32 1, %s2683_s24   ;;  %p3935_p13 = scmp.ne.s32.totalorder %s3920_s8, 0 }
 0x2f1   : > { %p3936_p0 = scmp.ge.s32.totalorder %s2695_s27, 2  ;;  %s2110_s16 = scalar_lea.sflag [#allocation5], %s2109_s9 }
 0x2f3   : > { %p2413_p5 = pnand %p3936_p0, %p3935_p13 }
 0x2f5   : > { %p2414_p10 = pneg %p2413_p5 }
 0x2f7   : > { %2678 = dma.done.wait (%p2414_p10), %s2110_s16, 4096  }
 0x2f8   : > { %2680 = vsyncadd (%p2414_p10), %s2110_s16, 4294963200  ;;  %p22_p2 = scmp.ge.s32.totalorder %s2827_s13, 4   ;;  %s3937_s24 = smov %s2687_s25 }
 0x2f9   : > { %s3938_s25 = smov %s2691_s26  ;;  %s3939_s26 = smov %s2848_s20 }
 0x2fa   : > { %s3940_s27 = smov %s2827_s13  ;;  %24 = sbr.rel (!%p22_p2) target bundleno = 9 (0x9), region = 108 }
 0x2ff   :  { %2115 = vsyncpa [#allocation4], 1 }
 0x300   :  { %2117 = vsyncpa [#allocation4 + $0x1], 1 }
 0x301   :  { %2118 = vsyncpa [#allocation7], 1 }
 0x302   :  { %2119 = vsyncpa [#allocation10], 1 }
 0x303   :  { %2120 = vsyncpa [#allocation5], 1 }
 0x304   :  { %2122 = vsyncpa [#allocation5 + $0x1], 1 }

</bundles_post_ra>
